<compile_context>
chip_gen: v6e
topology: v6e:2x2x1
jax: 0.10.0
libtpu: 0.0.40
codegen_flags: <defaults>
</compile_context>

<pallas_src>
from functools import partial

import jax
import jax.numpy as jnp
from jax import lax
from jax.experimental import pallas as pl
from jax.experimental.pallas import tpu as pltpu


def _round_up(x, m):
    return ((x + m - 1) // m) * m


def _mlp_kernel(num_layers, num_inputs, row_tile, num_sub,
                x_ref, w_ref, b_ref, out_ref, h0_ref):
    """Fused MLP forward for one batch tile. All operands live in VMEM.

    x_ref  : [TB, K0]   bf16  input tile, feature dim NOT padded
    w_ref  : [L, P, P]  bf16  packed zero-padded weights (y = x @ W layout)
    b_ref  : [L, P]     f32   packed zero-padded biases (dense 2D slab)
    out_ref: [TB, P]    f32   lane-dense padded output tile
    h0_ref : [TB, P]    bf16  scratch: input padded to the compute width P
    """
    # Lane-pad the narrow input tile to P inside the kernel (cheap VPU splat +
    # masked store); HBM only ever carries the narrow [TB, K0] bf16 stream.
    h0_ref[...] = jnp.zeros_like(h0_ref)
    h0_ref[:, :num_inputs] = x_ref[...]

    def sub_tile(s, carry):
        r0 = pl.multiple_of(s * row_tile, row_tile)
        h = h0_ref[pl.ds(r0, row_tile), :]                     # [RT, P] bf16
        for i in range(num_layers):                            # static unroll
            acc = jnp.dot(h, w_ref[i],
                          preferred_element_type=jnp.float32)  # [RT, P] f32
            acc = acc + b_ref[pl.ds(i, 1), :]                  # [1, P] f32 bias
            if i < num_layers - 1:                             # ReLU except last
                h = jnp.maximum(acc, 0.0).astype(jnp.bfloat16)
            else:
                h = acc
        out_ref[pl.ds(r0, row_tile), :] = h.astype(out_ref.dtype)
        return carry

    # Row sub-tiling bounds vreg pressure for large batch tiles.
    lax.fori_loop(0, num_sub, sub_tile, 0, unroll=True)


def pack_params(params, num_inputs):
    """Pack per-layer (W [in,out], b [out]) into resident slabs.

    Call ONCE (e.g. at model init) — hoisted out of the per-forward path so the
    per-call work is just the pallas_call (plus trivial batch-row padding).
    Weights are quantized to bf16 (intentional MXU approximation; the reference
    mirrors it).
    """
    num_layers = len(params)
    dims = [num_inputs] + [w.shape[1] for w, _ in params]
    p = max(128, _round_up(max(dims), 128))          # common lane-dense width
    w_slab = jnp.zeros((num_layers, p, p), jnp.bfloat16)
    b_slab = jnp.zeros((num_layers, p), jnp.float32)
    for i, (w, b) in enumerate(params):
        fi, fo = w.shape
        w_slab = w_slab.at[i, :fi, :fo].set(w.astype(jnp.bfloat16))
        b_slab = b_slab.at[i, :fo].set(b.astype(jnp.float32))
    return w_slab, b_slab


@partial(jax.jit, static_argnames=("num_outputs", "block_batch"))
def microneedle_forward(x, w_slab, b_slab, *, num_outputs, block_batch=512):
    """Forward pass. x: [batch, num_inputs] f32. Returns [batch, num_outputs] f32."""
    batch, num_inputs = x.shape
    num_layers, p, _ = w_slab.shape

    # --- batch tiling -------------------------------------------------------
    if batch <= block_batch:
        # Small batch: one grid step (per-step fixed overhead dominates).
        tb = _round_up(batch, 16)            # multiple of 16: bf16 sublane tile
    else:
        # Large batch: ~512-row tiles, but keep >=4 grid steps so v7x's 2
        # TensorCores each see >=2 steps (DMA/compute overlap per core).
        n_tiles = max(4, -(-batch // block_batch))
        tb = _round_up(-(-batch // n_tiles), 128)
    row_tile = min(128, tb)                  # in-kernel row sub-tile
    tb = _round_up(tb, row_tile)
    padded_batch = _round_up(batch, tb)
    num_sub = tb // row_tile

    # Input goes to the kernel as bf16 (the kernel rounds activations to bf16
    # before every matmul anyway) and with its feature dim UNPADDED.
    x_bf16 = x.astype(jnp.bfloat16)
    if padded_batch != batch:
        x_bf16 = jnp.pad(x_bf16, ((0, padded_batch - batch), (0, 0)))

    grid = (padded_batch // tb,)
    out_pad = pl.pallas_call(
        partial(_mlp_kernel, num_layers, num_inputs, row_tile, num_sub),
        grid=grid,
        in_specs=[
            # x tile: narrow feature dim (== full array extent, legal BlockSpec)
            pl.BlockSpec((tb, num_inputs), lambda i: (i, 0)),
            # weight slab: constant index_map -> DMA'd once, resident in VMEM
            pl.BlockSpec((num_layers, p, p), lambda i: (0, 0, 0)),
            # bias slab: dense 2D [L, P] (single (8,128) tile for L<=8)
            pl.BlockSpec((num_layers, p), lambda i: (0, 0)),
        ],
        out_specs=pl.BlockSpec((tb, p), lambda i: (i, 0)),
        out_shape=jax.ShapeDtypeStruct((padded_batch, p), jnp.float32),
        scratch_shapes=[pltpu.VMEM((tb, p), jnp.bfloat16)],   # padded input
        compiler_params=pltpu.CompilerParams(
            dimension_semantics=("parallel",),   # shard batch tiles on v7x TCs
            vmem_limit_bytes=32 * 1024 * 1024,
        ),
    )(x_bf16, w_slab, b_slab)

    return out_pad[:batch, :num_outputs]


def init_params(key, num_inputs, num_outputs, layer_sizes):
    """Deterministic init mimicking PyTorch nn.Linear: U(-1/sqrt(fan_in), ...).

    Weights are stored as [in, out] (transposed vs. nn.Linear) so the kernel
    computes y = x @ W + b directly.
    """
    sizes = [num_inputs] + list(layer_sizes) + [num_outputs]
    params = []
    for i in range(len(sizes) - 1):
        fan_in, fan_out = sizes[i], sizes[i + 1]
        key, kw, kb = jax.random.split(key, 3)
        bound = 1.0 / jnp.sqrt(jnp.float32(fan_in))
        w = jax.random.uniform(
            kw, (fan_in, fan_out), jnp.float32, minval=-bound, maxval=bound
        )
        b = jax.random.uniform(
            kb, (fan_out,), jnp.float32, minval=-bound, maxval=bound
        )
        params.append((w, b))
    return params


def reference_forward(x, params):
    """Pure-JAX reference mirroring the kernel's bf16-operand / f32-acc math."""
    h = x.astype(jnp.float32)
    for i, (w, b) in enumerate(params):
        h_q = h.astype(jnp.bfloat16).astype(jnp.float32)
        w_q = w.astype(jnp.bfloat16).astype(jnp.float32)
        h = jnp.dot(h_q, w_q, precision=jax.lax.Precision.HIGHEST) + b
        if i < len(params) - 1:
            h = jnp.maximum(h, 0.0)
    return h


if __name__ == "__main__":
    # Tabular regression MLP shapes consistent with the module.
    batch = 256
    num_inputs = 16
    layer_sizes = [32, 64, 32]
    num_outputs = 4

    key = jax.random.PRNGKey(0)
    key, kx, kx2 = jax.random.split(key, 3)
    x = jax.random.normal(kx, (batch, num_inputs), jnp.float32)
    params = init_params(key, num_inputs, num_outputs, layer_sizes)

    # Packing hoisted out of the per-call path (done once).
    w_slab, b_slab = pack_params(params, num_inputs)

    out = jax.block_until_ready(
        microneedle_forward(x, w_slab, b_slab, num_outputs=num_outputs))
    ref = reference_forward(x, params)
    assert out.shape == (batch, num_outputs)
    assert jnp.allclose(out, ref, atol=2e-3, rtol=2e-3), "mismatch vs reference"

    # Second, ragged batch (exercises row padding / single-sub-tile path).
    x2 = jax.random.normal(kx2, (37, num_inputs), jnp.float32)
    out2 = jax.block_until_ready(
        microneedle_forward(x2, w_slab, b_slab, num_outputs=num_outputs))
    ref2 = reference_forward(x2, params)
    assert out2.shape == (37, num_outputs)
    assert jnp.allclose(out2, ref2, atol=2e-3, rtol=2e-3), "mismatch (ragged)"

    print("KERNEL_OK")
</pallas_src>

<mosaic_0001>
module attributes {stable_mosaic.version = 11 : i64} {
  func.func @_mlp_kernel(%arg0: i32, %arg1: memref<256x16xbf16, #tpu.memory_space<vmem>>, %arg2: memref<4x128x128xbf16, #tpu.memory_space<vmem>>, %arg3: memref<4x128xf32, #tpu.memory_space<vmem>>, %arg4: memref<256x128xf32, #tpu.memory_space<vmem>>, %arg5: memref<256x128xbf16, #tpu.memory_space<vmem>>) attributes {dimension_semantics = [#tpu.dimension_semantics<parallel>], iteration_bounds = array<i64: 1>, scalar_prefetch = 0 : i64, scratch_operands = 1 : i64, tpu.core_type = #tpu.core_type<tc>, window_params = [{transform_indices = @transform_0, window_bounds = array<i64: 256, 16>}, {pipeline_mode = #tpu.pipeline_mode<synchronous>, transform_indices = @transform_1, window_bounds = array<i64: 4, 128, 128>}, {pipeline_mode = #tpu.pipeline_mode<synchronous>, transform_indices = @transform_2, window_bounds = array<i64: 4, 128>}, {transform_indices = @transform_3, window_bounds = array<i64: 256, 128>}]} {
    %cst = arith.constant 0.000000e+00 : bf16
    %0 = vector.broadcast %cst : bf16 to vector<256x128xbf16>
    %c0 = arith.constant 0 : index
    %c0_0 = arith.constant 0 : index
    %1 = vector.load %arg5[%c0, %c0_0] : memref<256x128xbf16, #tpu.memory_space<vmem>>, vector<256x128xbf16>
    tpu.vector_store %arg5[%c0, %c0_0], %0 {strides = array<i32>} : memref<256x128xbf16, #tpu.memory_space<vmem>>, vector<256x128xbf16>,
    %c0_1 = arith.constant 0 : index
    %c0_2 = arith.constant 0 : index
    %2 = vector.load %arg1[%c0_1, %c0_2] : memref<256x16xbf16, #tpu.memory_space<vmem>>, vector<256x16xbf16>
    %c0_3 = arith.constant 0 : index
    %c0_4 = arith.constant 0 : index
    %3 = vector.load %arg5[%c0_3, %c0_4] : memref<256x128xbf16, #tpu.memory_space<vmem>>, vector<256x16xbf16>
    tpu.vector_store %arg5[%c0_3, %c0_4], %2 {strides = array<i32>} : memref<256x128xbf16, #tpu.memory_space<vmem>>, vector<256x16xbf16>,
    %c0_i32 = arith.constant 0 : i32
    %c128_i32 = arith.constant 128 : i32
    %4 = arith.muli %c0_i32, %c128_i32 : i32
    %5 = tpu.assume_multiple %4, 128 : i32
    %6 = arith.index_cast %5 : i32 to index
    %c0_5 = arith.constant 0 : index
    %7 = vector.load %arg5[%6, %c0_5] : memref<256x128xbf16, #tpu.memory_space<vmem>>, vector<128x128xbf16>
    %c0_6 = arith.constant 0 : index
    %c0_7 = arith.constant 0 : index
    %c0_8 = arith.constant 0 : index
    %8 = vector.load %arg2[%c0_6, %c0_7, %c0_8] : memref<4x128x128xbf16, #tpu.memory_space<vmem>>, vector<1x128x128xbf16>
    %9 = vector.shape_cast %8 : vector<1x128x128xbf16> to vector<128x128xbf16>
    %cst_9 = arith.constant dense<0.000000e+00> : vector<128x128xf32>
    %10 = tpu.matmul %7, %9, %cst_9 {dimension_numbers = #tpu.dot_dimension_numbers<[1], [0], [0], [1], [0, 0, 1, 1], [], []>} : vector<128x128xbf16>, vector<128x128xbf16>, vector<128x128xf32> -> vector<128x128xf32>
    %c0_10 = arith.constant 0 : index
    %c0_11 = arith.constant 0 : index
    %11 = vector.load %arg3[%c0_10, %c0_11] : memref<4x128xf32, #tpu.memory_space<vmem>>, vector<1x128xf32>
    %12 = vector.broadcast %11 : vector<1x128xf32> to vector<128x128xf32>
    %13 = arith.addf %10, %12 : vector<128x128xf32>
    %cst_12 = arith.constant 0.000000e+00 : f32
    %14 = vector.broadcast %cst_12 : f32 to vector<128x128xf32>
    %15 = arith.maximumf %13, %14 : vector<128x128xf32>
    %16 = arith.truncf %15 : vector<128x128xf32> to vector<128x128xbf16>
    %c1 = arith.constant 1 : index
    %c0_13 = arith.constant 0 : index
    %c0_14 = arith.constant 0 : index
    %17 = vector.load %arg2[%c1, %c0_13, %c0_14] : memref<4x128x128xbf16, #tpu.memory_space<vmem>>, vector<1x128x128xbf16>
    %18 = vector.shape_cast %17 : vector<1x128x128xbf16> to vector<128x128xbf16>
    %cst_15 = arith.constant dense<0.000000e+00> : vector<128x128xf32>
    %19 = tpu.matmul %16, %18, %cst_15 {dimension_numbers = #tpu.dot_dimension_numbers<[1], [0], [0], [1], [0, 0, 1, 1], [], []>} : vector<128x128xbf16>, vector<128x128xbf16>, vector<128x128xf32> -> vector<128x128xf32>
    %c1_16 = arith.constant 1 : index
    %c0_17 = arith.constant 0 : index
    %20 = vector.load %arg3[%c1_16, %c0_17] : memref<4x128xf32, #tpu.memory_space<vmem>>, vector<1x128xf32>
    %21 = vector.broadcast %20 : vector<1x128xf32> to vector<128x128xf32>
    %22 = arith.addf %19, %21 : vector<128x128xf32>
    %cst_18 = arith.constant 0.000000e+00 : f32
    %23 = vector.broadcast %cst_18 : f32 to vector<128x128xf32>
    %24 = arith.maximumf %22, %23 : vector<128x128xf32>
    %25 = arith.truncf %24 : vector<128x128xf32> to vector<128x128xbf16>
    %c2 = arith.constant 2 : index
    %c0_19 = arith.constant 0 : index
    %c0_20 = arith.constant 0 : index
    %26 = vector.load %arg2[%c2, %c0_19, %c0_20] : memref<4x128x128xbf16, #tpu.memory_space<vmem>>, vector<1x128x128xbf16>
    %27 = vector.shape_cast %26 : vector<1x128x128xbf16> to vector<128x128xbf16>
    %cst_21 = arith.constant dense<0.000000e+00> : vector<128x128xf32>
    %28 = tpu.matmul %25, %27, %cst_21 {dimension_numbers = #tpu.dot_dimension_numbers<[1], [0], [0], [1], [0, 0, 1, 1], [], []>} : vector<128x128xbf16>, vector<128x128xbf16>, vector<128x128xf32> -> vector<128x128xf32>
    %c2_22 = arith.constant 2 : index
    %c0_23 = arith.constant 0 : index
    %29 = vector.load %arg3[%c2_22, %c0_23] : memref<4x128xf32, #tpu.memory_space<vmem>>, vector<1x128xf32>
    %30 = vector.broadcast %29 : vector<1x128xf32> to vector<128x128xf32>
    %31 = arith.addf %28, %30 : vector<128x128xf32>
    %cst_24 = arith.constant 0.000000e+00 : f32
    %32 = vector.broadcast %cst_24 : f32 to vector<128x128xf32>
    %33 = arith.maximumf %31, %32 : vector<128x128xf32>
    %34 = arith.truncf %33 : vector<128x128xf32> to vector<128x128xbf16>
    %c3 = arith.constant 3 : index
    %c0_25 = arith.constant 0 : index
    %c0_26 = arith.constant 0 : index
    %35 = vector.load %arg2[%c3, %c0_25, %c0_26] : memref<4x128x128xbf16, #tpu.memory_space<vmem>>, vector<1x128x128xbf16>
    %36 = vector.shape_cast %35 : vector<1x128x128xbf16> to vector<128x128xbf16>
    %cst_27 = arith.constant dense<0.000000e+00> : vector<128x128xf32>
    %37 = tpu.matmul %34, %36, %cst_27 {dimension_numbers = #tpu.dot_dimension_numbers<[1], [0], [0], [1], [0, 0, 1, 1], [], []>} : vector<128x128xbf16>, vector<128x128xbf16>, vector<128x128xf32> -> vector<128x128xf32>
    %c3_28 = arith.constant 3 : index
    %c0_29 = arith.constant 0 : index
    %38 = vector.load %arg3[%c3_28, %c0_29] : memref<4x128xf32, #tpu.memory_space<vmem>>, vector<1x128xf32>
    %39 = vector.broadcast %38 : vector<1x128xf32> to vector<128x128xf32>
    %40 = arith.addf %37, %39 : vector<128x128xf32>
    %41 = arith.index_cast %5 : i32 to index
    %c0_30 = arith.constant 0 : index
    %42 = vector.load %arg4[%41, %c0_30] : memref<256x128xf32, #tpu.memory_space<vmem>>, vector<128x128xf32>
    tpu.vector_store %arg4[%41, %c0_30], %40 {strides = array<i32>} : memref<256x128xf32, #tpu.memory_space<vmem>>, vector<128x128xf32>,
    %c1_i32 = arith.constant 1 : i32
    %c128_i32_31 = arith.constant 128 : i32
    %43 = arith.muli %c1_i32, %c128_i32_31 : i32
    %44 = tpu.assume_multiple %43, 128 : i32
    %45 = arith.index_cast %44 : i32 to index
    %c0_32 = arith.constant 0 : index
    %46 = vector.load %arg5[%45, %c0_32] : memref<256x128xbf16, #tpu.memory_space<vmem>>, vector<128x128xbf16>
    %c0_33 = arith.constant 0 : index
    %c0_34 = arith.constant 0 : index
    %c0_35 = arith.constant 0 : index
    %47 = vector.load %arg2[%c0_33, %c0_34, %c0_35] : memref<4x128x128xbf16, #tpu.memory_space<vmem>>, vector<1x128x128xbf16>
    %48 = vector.shape_cast %47 : vector<1x128x128xbf16> to vector<128x128xbf16>
    %cst_36 = arith.constant dense<0.000000e+00> : vector<128x128xf32>
    %49 = tpu.matmul %46, %48, %cst_36 {dimension_numbers = #tpu.dot_dimension_numbers<[1], [0], [0], [1], [0, 0, 1, 1], [], []>} : vector<128x128xbf16>, vector<128x128xbf16>, vector<128x128xf32> -> vector<128x128xf32>
    %c0_37 = arith.constant 0 : index
    %c0_38 = arith.constant 0 : index
    %50 = vector.load %arg3[%c0_37, %c0_38] : memref<4x128xf32, #tpu.memory_space<vmem>>, vector<1x128xf32>
    %51 = vector.broadcast %50 : vector<1x128xf32> to vector<128x128xf32>
    %52 = arith.addf %49, %51 : vector<128x128xf32>
    %cst_39 = arith.constant 0.000000e+00 : f32
    %53 = vector.broadcast %cst_39 : f32 to vector<128x128xf32>
    %54 = arith.maximumf %52, %53 : vector<128x128xf32>
    %55 = arith.truncf %54 : vector<128x128xf32> to vector<128x128xbf16>
    %c1_40 = arith.constant 1 : index
    %c0_41 = arith.constant 0 : index
    %c0_42 = arith.constant 0 : index
    %56 = vector.load %arg2[%c1_40, %c0_41, %c0_42] : memref<4x128x128xbf16, #tpu.memory_space<vmem>>, vector<1x128x128xbf16>
    %57 = vector.shape_cast %56 : vector<1x128x128xbf16> to vector<128x128xbf16>
    %cst_43 = arith.constant dense<0.000000e+00> : vector<128x128xf32>
    %58 = tpu.matmul %55, %57, %cst_43 {dimension_numbers = #tpu.dot_dimension_numbers<[1], [0], [0], [1], [0, 0, 1, 1], [], []>} : vector<128x128xbf16>, vector<128x128xbf16>, vector<128x128xf32> -> vector<128x128xf32>
    %c1_44 = arith.constant 1 : index
    %c0_45 = arith.constant 0 : index
    %59 = vector.load %arg3[%c1_44, %c0_45] : memref<4x128xf32, #tpu.memory_space<vmem>>, vector<1x128xf32>
    %60 = vector.broadcast %59 : vector<1x128xf32> to vector<128x128xf32>
    %61 = arith.addf %58, %60 : vector<128x128xf32>
    %cst_46 = arith.constant 0.000000e+00 : f32
    %62 = vector.broadcast %cst_46 : f32 to vector<128x128xf32>
    %63 = arith.maximumf %61, %62 : vector<128x128xf32>
    %64 = arith.truncf %63 : vector<128x128xf32> to vector<128x128xbf16>
    %c2_47 = arith.constant 2 : index
    %c0_48 = arith.constant 0 : index
    %c0_49 = arith.constant 0 : index
    %65 = vector.load %arg2[%c2_47, %c0_48, %c0_49] : memref<4x128x128xbf16, #tpu.memory_space<vmem>>, vector<1x128x128xbf16>
    %66 = vector.shape_cast %65 : vector<1x128x128xbf16> to vector<128x128xbf16>
    %cst_50 = arith.constant dense<0.000000e+00> : vector<128x128xf32>
    %67 = tpu.matmul %64, %66, %cst_50 {dimension_numbers = #tpu.dot_dimension_numbers<[1], [0], [0], [1], [0, 0, 1, 1], [], []>} : vector<128x128xbf16>, vector<128x128xbf16>, vector<128x128xf32> -> vector<128x128xf32>
    %c2_51 = arith.constant 2 : index
    %c0_52 = arith.constant 0 : index
    %68 = vector.load %arg3[%c2_51, %c0_52] : memref<4x128xf32, #tpu.memory_space<vmem>>, vector<1x128xf32>
    %69 = vector.broadcast %68 : vector<1x128xf32> to vector<128x128xf32>
    %70 = arith.addf %67, %69 : vector<128x128xf32>
    %cst_53 = arith.constant 0.000000e+00 : f32
    %71 = vector.broadcast %cst_53 : f32 to vector<128x128xf32>
    %72 = arith.maximumf %70, %71 : vector<128x128xf32>
    %73 = arith.truncf %72 : vector<128x128xf32> to vector<128x128xbf16>
    %c3_54 = arith.constant 3 : index
    %c0_55 = arith.constant 0 : index
    %c0_56 = arith.constant 0 : index
    %74 = vector.load %arg2[%c3_54, %c0_55, %c0_56] : memref<4x128x128xbf16, #tpu.memory_space<vmem>>, vector<1x128x128xbf16>
    %75 = vector.shape_cast %74 : vector<1x128x128xbf16> to vector<128x128xbf16>
    %cst_57 = arith.constant dense<0.000000e+00> : vector<128x128xf32>
    %76 = tpu.matmul %73, %75, %cst_57 {dimension_numbers = #tpu.dot_dimension_numbers<[1], [0], [0], [1], [0, 0, 1, 1], [], []>} : vector<128x128xbf16>, vector<128x128xbf16>, vector<128x128xf32> -> vector<128x128xf32>
    %c3_58 = arith.constant 3 : index
    %c0_59 = arith.constant 0 : index
    %77 = vector.load %arg3[%c3_58, %c0_59] : memref<4x128xf32, #tpu.memory_space<vmem>>, vector<1x128xf32>
    %78 = vector.broadcast %77 : vector<1x128xf32> to vector<128x128xf32>
    %79 = arith.addf %76, %78 : vector<128x128xf32>
    %80 = arith.index_cast %44 : i32 to index
    %c0_60 = arith.constant 0 : index
    %81 = vector.load %arg4[%80, %c0_60] : memref<256x128xf32, #tpu.memory_space<vmem>>, vector<128x128xf32>
    tpu.vector_store %arg4[%80, %c0_60], %79 {strides = array<i32>} : memref<256x128xf32, #tpu.memory_space<vmem>>, vector<128x128xf32>,
    %c2_i32 = arith.constant 2 : i32
    return
  }
  func.func @transform_0(%arg0: i32) -> (i32, i32) {
    %c0_i32 = arith.constant 0 : i32
    %c0_i32_0 = arith.constant 0 : i32
    return %arg0, %c0_i32 : i32, i32
  }
  func.func @transform_1(%arg0: i32) -> (i32, i32, i32) {
    %c0_i32 = arith.constant 0 : i32
    %c0_i32_0 = arith.constant 0 : i32
    %c0_i32_1 = arith.constant 0 : i32
    %c0_i32_2 = arith.constant 0 : i32
    return %c0_i32, %c0_i32_0, %c0_i32_1 : i32, i32, i32
  }
  func.func @transform_2(%arg0: i32) -> (i32, i32) {
    %c0_i32 = arith.constant 0 : i32
    %c0_i32_0 = arith.constant 0 : i32
    %c0_i32_1 = arith.constant 0 : i32
    return %c0_i32, %c0_i32_0 : i32, i32
  }
  func.func @transform_3(%arg0: i32) -> (i32, i32) {
    %c0_i32 = arith.constant 0 : i32
    %c0_i32_0 = arith.constant 0 : i32
    return %arg0, %c0_i32 : i32, i32
  }
}

</mosaic_0001>

<bundles_post_ra>
// kernel: microneedle_forward.1
= control target key start
LH: loop header
LB: loop body
LE: loop exit
PB: predicated region body
PF: predicated region fallthrough
CT: control target
= control target key end

     0   :  { %8 = vsyncpa [#allocation4], 0  ;;  %s2362_s12 = smov [#allocation3]   ;;  %s2765_s0 = inlined_call_operand.vmem [shape: bf16[256,16], index: 0, kind: input, shape index: {}]   ;;  %s2766_s1 = inlined_call_operand.hbm [shape: bf16[4,128,128], index: 1, kind: input, shape index: {}]   ;;  %s2767_s2 = inlined_call_operand.vmem [shape: f32[4,128], index: 2, kind: input, shape index: {}]   ;;  %s2768_s3 = inlined_call_operand.vmem [shape: f32[256,128], index: 3, kind: output, shape index: {}]  }
   0x1   :  { %s16_s13 = sshll.u32 %s2362_s12, 4  ;;  %s17_s13 = int_to_ptr.vmem [resolvable:$true] %s16_s13 }
   0x2   :  { %s2348_s14 = scalar_lea.vmem %s17_s13, 4096  ;;  %p2353_p1 = scmp.lt.s32.totalorder %s17_s13, %s17_s13 }
   0x3   :  { %p2349_p0 = scmp.ne.s32.totalorder %s17_s13, %s2348_s14  ;;  %p2354_p2 = scmp.lt.s32.totalorder %s2348_s14, %s2348_s14 }
   0x5   :  { %p2355_p3 = por %p2354_p2, %p2353_p1 }
   0x7   :  { %p2356_p4 = pnand %p2355_p3, %p2349_p0 }
   0x9   :  { %2359 = shalt.err (!%p2356_p4)
}
   0xa   :  { %s2363_s15 = smov 64   ;;  %s2364_s16 = smov 4  }
   0xb   :  { %22 = dma.hbm_to_vmem [thread:$0]  %s2766_s1, 4096, %s17_s13, [#allocation4], %s2363_s15, %s2363_s15, %s2364_s16  }
   0xc   :  { %2360 = dma.done.wait [#allocation4], 4096  }
   0xd   :  { %2361 = vsyncadd [#allocation4], 4294963200  ;;  %v2365_v0 = vmov 0   ;;  %v2260_v1 = vld [vmem:[#allocation3 + $0x38] sm:$0xff]   ;;  %v2261_v2 = vld [vmem:[#allocation3 + $0x30] sm:$0xff]   ;;  %vm93_vm0 = vcmask 125952  }
   0xe   :  { %29 = vst [vmem:[#allocation2] sm:$0xf] %v2365_v0  ;;  %30 = vst [vmem:[#allocation2 + $0x4] sm:$0xf] %v2365_v0  ;;  %2000 = vmatprep.subr.bf16.mxu0 %v2260_v1  ;;  %v2262_v3 = vld [vmem:[#allocation3 + $0x28] sm:$0xff]   ;;  %v2263_v4 = vld [vmem:[#allocation3 + $0x20] sm:$0xff]  }
   0xf   :  { %31 = vst [vmem:[#allocation2 + $0x8] sm:$0xf] %v2365_v0  ;;  %32 = vst [vmem:[#allocation2 + $0xc] sm:$0xf] %v2365_v0  ;;  %2001 = vmatpush3.bf16.msra.mxu0 %v2260_v1  ;;  %v61_v5 = vld [vmem:[%s2765_s0] sm:$0xf] }
  0x10   :  { %33 = vst [vmem:[#allocation2 + $0x10] sm:$0xf] %v2365_v0  ;;  %34 = vst [vmem:[#allocation2 + $0x14] sm:$0xf] %v2365_v0  ;;  %2002 = vmatprep.subr.bf16.mxu0 %v2261_v2  ;;  %v62_v6 = vld [vmem:[%s2765_s0 + $0x4] sm:$0xf] }
  0x11   :  { %35 = vst [vmem:[#allocation2 + $0x18] sm:$0xf] %v2365_v0  ;;  %36 = vst [vmem:[#allocation2 + $0x1c] sm:$0xf] %v2365_v0  ;;  %v63_v7 = vld [vmem:[%s2765_s0 + $0x8] sm:$0xf] }
  0x12   :  { %37 = vst [vmem:[#allocation2 + $0x20] sm:$0xf] %v2365_v0  ;;  %38 = vst [vmem:[#allocation2 + $0x24] sm:$0xf] %v2365_v0  ;;  %v64_v8 = vld [vmem:[%s2765_s0 + $0xc] sm:$0xf] }
  0x13   :  { %39 = vst [vmem:[#allocation2 + $0x28] sm:$0xf] %v2365_v0  ;;  %40 = vst [vmem:[#allocation2 + $0x2c] sm:$0xf] %v2365_v0  ;;  %2003 = vmatpush3.bf16.msra.mxu0 %v2261_v2  ;;  %v65_v9 = vld [vmem:[%s2765_s0 + $0x10] sm:$0xf] }
  0x14   :  { %41 = vst [vmem:[#allocation2 + $0x30] sm:$0xf] %v2365_v0  ;;  %42 = vst [vmem:[#allocation2 + $0x34] sm:$0xf] %v2365_v0  ;;  %2004 = vmatprep.subr.bf16.mxu0 %v2262_v3  ;;  %v66_v10 = vld [vmem:[%s2765_s0 + $0x14] sm:$0xf] }
  0x15   :  { %43 = vst [vmem:[#allocation2 + $0x38] sm:$0xf] %v2365_v0  ;;  %44 = vst [vmem:[#allocation2 + $0x3c] sm:$0xf] %v2365_v0  ;;  %v2264_v11 = vld [vmem:[#allocation3 + $0x18] sm:$0xff]   ;;  %v2265_v22 = vld [vmem:[#allocation3 + $0x10] sm:$0xff]  }
  0x16   :  { %45 = vst [vmem:[#allocation2 + $0x40] sm:$0xf] %v2365_v0  ;;  %46 = vst [vmem:[#allocation2 + $0x44] sm:$0xf] %v2365_v0  ;;  %v67_v12 = vld [vmem:[%s2765_s0 + $0x18] sm:$0xf] }
  0x17   :  { %47 = vst [vmem:[#allocation2 + $0x48] sm:$0xf] %v2365_v0  ;;  %48 = vst [vmem:[#allocation2 + $0x4c] sm:$0xf] %v2365_v0  ;;  %v68_v13 = vld [vmem:[%s2765_s0 + $0x1c] sm:$0xf]  ;;  %2005 = vmatpush3.bf16.msra.mxu0 %v2262_v3 }
  0x18   :  { %49 = vst [vmem:[#allocation2 + $0x50] sm:$0xf] %v2365_v0  ;;  %50 = vst [vmem:[#allocation2 + $0x54] sm:$0xf] %v2365_v0  ;;  %v69_v14 = vld [vmem:[%s2765_s0 + $0x20] sm:$0xf]  ;;  %2006 = vmatprep.subr.bf16.mxu0 %v2263_v4 }
  0x19   :  { %51 = vst [vmem:[#allocation2 + $0x58] sm:$0xf] %v2365_v0  ;;  %52 = vst [vmem:[#allocation2 + $0x5c] sm:$0xf] %v2365_v0  ;;  %v70_v15 = vld [vmem:[%s2765_s0 + $0x24] sm:$0xf] }
  0x1a   :  { %53 = vst [vmem:[#allocation2 + $0x60] sm:$0xf] %v2365_v0  ;;  %54 = vst [vmem:[#allocation2 + $0x64] sm:$0xf] %v2365_v0  ;;  %v71_v16 = vld [vmem:[%s2765_s0 + $0x28] sm:$0xf] }
  0x1b   :  { %55 = vst [vmem:[#allocation2 + $0x68] sm:$0xf] %v2365_v0  ;;  %56 = vst [vmem:[#allocation2 + $0x6c] sm:$0xf] %v2365_v0  ;;  %v72_v17 = vld [vmem:[%s2765_s0 + $0x2c] sm:$0xf]  ;;  %2007 = vmatpush3.bf16.msra.mxu0 %v2263_v4 }
  0x1c   :  { %57 = vst [vmem:[#allocation2 + $0x70] sm:$0xf] %v2365_v0  ;;  %58 = vst [vmem:[#allocation2 + $0x74] sm:$0xf] %v2365_v0  ;;  %v73_v18 = vld [vmem:[%s2765_s0 + $0x30] sm:$0xf]  ;;  %2008 = vmatprep.subr.bf16.mxu0 %v2264_v11 }
  0x1d   :  { %59 = vst [vmem:[#allocation2 + $0x78] sm:$0xf] %v2365_v0  ;;  %60 = vst [vmem:[#allocation2 + $0x7c] sm:$0xf] %v2365_v0  ;;  %v74_v19 = vld [vmem:[%s2765_s0 + $0x34] sm:$0xf] }
  0x1e   :  { %94 = vst.msk [vmem:[#allocation2] sm:$0xf] %vm93_vm0, %v61_v5  ;;  %95 = vst.msk [vmem:[#allocation2 + $0x4] sm:$0xf] %vm93_vm0, %v62_v6  ;;  %v75_v20 = vld [vmem:[%s2765_s0 + $0x38] sm:$0xf] }
  0x1f   :  { %96 = vst.msk [vmem:[#allocation2 + $0x8] sm:$0xf] %vm93_vm0, %v63_v7  ;;  %97 = vst.msk [vmem:[#allocation2 + $0xc] sm:$0xf] %vm93_vm0, %v64_v8  ;;  %v76_v21 = vld [vmem:[%s2765_s0 + $0x3c] sm:$0xf]  ;;  %2009 = vmatpush3.bf16.msra.mxu0 %v2264_v11 }
  0x20   :  { %98 = vst.msk [vmem:[#allocation2 + $0x10] sm:$0xf] %vm93_vm0, %v65_v9  ;;  %99 = vst.msk [vmem:[#allocation2 + $0x14] sm:$0xf] %vm93_vm0, %v66_v10  ;;  %v2276_v23 = vld [vmem:[#allocation3 + $0x78] sm:$0xff]   ;;  %v2277_v24 = vld [vmem:[#allocation3 + $0x70] sm:$0xff]   ;;  %2010 = vmatprep.subr.bf16.mxu0 %v2265_v22 }
  0x21   :  { %100 = vst.msk [vmem:[#allocation2 + $0x18] sm:$0xf] %vm93_vm0, %v67_v12  ;;  %101 = vst.msk [vmem:[#allocation2 + $0x1c] sm:$0xf] %vm93_vm0, %v68_v13  ;;  %2032 = vmatprep.subr.bf16.mxu1 %v2276_v23  ;;  %v2266_v26 = vld [vmem:[#allocation3 + $0x8] sm:$0xff]   ;;  %v2267_v27 = vld [vmem:[#allocation3] sm:$0xff]  }
  0x22   :  { %102 = vst.msk [vmem:[#allocation2 + $0x20] sm:$0xf] %vm93_vm0, %v69_v14  ;;  %103 = vst.msk [vmem:[#allocation2 + $0x24] sm:$0xf] %vm93_vm0, %v70_v15  ;;  %2033 = vmatpush3.bf16.msra.mxu1 %v2276_v23  ;;  %v2278_v28 = vld [vmem:[#allocation3 + $0x68] sm:$0xff]   ;;  %v2279_v29 = vld [vmem:[#allocation3 + $0x60] sm:$0xff]  }
  0x23   :  { %104 = vst.msk [vmem:[#allocation2 + $0x28] sm:$0xf] %vm93_vm0, %v71_v16  ;;  %105 = vst.msk [vmem:[#allocation2 + $0x2c] sm:$0xf] %vm93_vm0, %v72_v17  ;;  %2034 = vmatprep.subr.bf16.mxu1 %v2277_v24  ;;  %2011 = vmatpush3.bf16.msra.mxu0 %v2265_v22  ;;  %v2280_v30 = vld [vmem:[#allocation3 + $0x58] sm:$0xff]   ;;  %v2281_v38 = vld [vmem:[#allocation3 + $0x50] sm:$0xff]  }
  0x24   :  { %106 = vst.msk [vmem:[#allocation2 + $0x30] sm:$0xf] %vm93_vm0, %v73_v18  ;;  %107 = vst.msk [vmem:[#allocation2 + $0x34] sm:$0xf] %vm93_vm0, %v74_v19  ;;  %2012 = vmatprep.subr.bf16.mxu0 %v2266_v26  ;;  %v2282_v39 = vld [vmem:[#allocation3 + $0x48] sm:$0xff]   ;;  %v2283_v40 = vld [vmem:[#allocation3 + $0x40] sm:$0xff]  }
  0x25   :  { %108 = vst.msk [vmem:[#allocation2 + $0x38] sm:$0xf] %vm93_vm0, %v75_v20  ;;  %109 = vst.msk [vmem:[#allocation2 + $0x3c] sm:$0xf] %vm93_vm0, %v76_v21  ;;  %v2268_v25 = vld [vmem:[#allocation2] sm:$0xff]   ;;  %v2284_v41 = vld [vmem:[#allocation3 + $0xb8] sm:$0xff]  }
  0x26   :  { %2016 = vmatprep.mubr.bf16.mxu0 %v2268_v25  ;;  %2035 = vmatpush3.bf16.msra.mxu1 %v2277_v24  ;;  %v2269_v31 = vld [vmem:[#allocation2 + $0x8] sm:$0xff]   ;;  %v2285_v42 = vld [vmem:[#allocation3 + $0xb0] sm:$0xff]   ;;  %v2287_v44 = vld [vmem:[#allocation3 + $0xa0] sm:$0xff]  }
  0x27   :  { %2036 = vmatprep.subr.bf16.mxu1 %v2278_v28  ;;  %2013 = vmatpush3.bf16.msra.mxu0 %v2266_v26  ;;  %v2270_v32 = vld [vmem:[#allocation2 + $0x10] sm:$0xff]   ;;  %v2286_v43 = vld [vmem:[#allocation3 + $0xa8] sm:$0xff]   ;;  %v2288_v45 = vld [vmem:[#allocation3 + $0x98] sm:$0xff]  }
  0x28   :  { %2014 = vmatprep.subr.bf16.mxu0 %v2267_v27  ;;  %v2271_v33 = vld [vmem:[#allocation2 + $0x18] sm:$0xff]   ;;  %v2456_v48 = vld [vmem:[%s2767_s2] ss:$0 sm:$0xff] }
  0x29   :  { %v2272_v34 = vld [vmem:[#allocation2 + $0x20] sm:$0xff]  }
  0x2a   :  { %2037 = vmatpush3.bf16.msra.mxu1 %v2278_v28  ;;  %v2273_v35 = vld [vmem:[#allocation2 + $0x28] sm:$0xff]  }
  0x2b   :  { %2038 = vmatprep.subr.bf16.mxu1 %v2279_v29  ;;  %2015 = vmatpush3.bf16.msra.mxu0 %v2267_v27  ;;  %v2274_v36 = vld [vmem:[#allocation2 + $0x30] sm:$0xff]  }
  0x2c   :  { %v2275_v37 = vld [vmem:[#allocation2 + $0x38] sm:$0xff]   ;;  %2064 = vmatprep.subr.bf16.mxu0 %v2284_v41 }
  0x2e   :  { %2039 = vmatpush3.bf16.msra.mxu1 %v2279_v29  ;;  %2017 = vmatmul.mubr.bf16.vlgmr.msra.gmra.mxu0 %v2269_v31 }
  0x2f   :  { %2040 = vmatprep.subr.bf16.mxu1 %v2280_v30  ;;  %2020 = vmatprep.mubr.bf16.mxu0 %v2270_v32 }
  0x30   :  { %2065 = vmatpush3.bf16.msra.mxu0 %v2284_v41  ;;  %v2291_v41 = vld [vmem:[#allocation3 + $0x80] sm:$0xff]  }
  0x31   :  { %2066 = vmatprep.subr.bf16.mxu0 %v2285_v42 }
  0x32   :  { %2041 = vmatpush3.bf16.msra.mxu1 %v2280_v30 }
  0x33   :  { %2042 = vmatprep.subr.bf16.mxu1 %v2281_v38 }
  0x34   :  { %2067 = vmatpush3.bf16.msra.mxu0 %v2285_v42  ;;  %v2474_v42 = vld [vmem:[#allocation3 + $0x38] sm:$0xff]  }
  0x35   :  { %2068 = vmatprep.subr.bf16.mxu0 %v2286_v43 }
  0x36   :  { %2021 = vmatmul.mubr.bf16.gmra.mxu0 %v2271_v33  ;;  %2043 = vmatpush3.bf16.msra.mxu1 %v2281_v38 }
  0x37   :  { %2024 = vmatprep.mubr.bf16.mxu0 %v2272_v34  ;;  %2044 = vmatprep.subr.bf16.mxu1 %v2282_v39 }
  0x38   :  { %2069 = vmatpush3.bf16.msra.mxu0 %v2286_v43  ;;  %v77_v43 = vld [vmem:[%s2765_s0 + $0x40] sm:$0xf] }
  0x39   :  { %2070 = vmatprep.subr.bf16.mxu0 %v2287_v44  ;;  %110 = vst.msk [vmem:[#allocation2 + $0x40] sm:$0xf] %vm93_vm0, %v77_v43  ;;  %v2296_v43 = vld [vmem:[#allocation3 + $0x18] sm:$0xff]  }
  0x3a   :  { %2045 = vmatpush3.bf16.msra.mxu1 %v2282_v39  ;;  %v2289_v39 = vld [vmem:[#allocation3 + $0x90] sm:$0xff]  }
  0x3b   :  { %2046 = vmatprep.subr.bf16.mxu1 %v2283_v40 }
  0x3c   :  { %2071 = vmatpush3.bf16.msra.mxu0 %v2287_v44  ;;  %v78_v44 = vld [vmem:[%s2765_s0 + $0x44] sm:$0xf] }
  0x3d   :  { %2072 = vmatprep.subr.bf16.mxu0 %v2288_v45  ;;  %111 = vst.msk [vmem:[#allocation2 + $0x44] sm:$0xf] %vm93_vm0, %v78_v44 }
  0x3e   :  { %2025 = vmatmul.mubr.bf16.gmra.mxu0 %v2273_v35  ;;  %2047 = vmatpush3.bf16.msra.mxu1 %v2283_v40  ;;  %v2290_v40 = vld [vmem:[#allocation3 + $0x88] sm:$0xff]  }
  0x3f   :  { %2028 = vmatprep.mubr.bf16.mxu0 %v2274_v36 }
  0x40   :  { %2073 = vmatpush3.bf16.msra.mxu0 %v2288_v45  ;;  %v79_v45 = vld [vmem:[%s2765_s0 + $0x48] sm:$0xf] }
  0x41   :  { %2074 = vmatprep.subr.bf16.mxu0 %v2289_v39  ;;  %112 = vst.msk [vmem:[#allocation2 + $0x48] sm:$0xf] %vm93_vm0, %v79_v45 }
  0x44   :  { %2075 = vmatpush3.bf16.msra.mxu0 %v2289_v39 }
  0x45   :  { %2076 = vmatprep.subr.bf16.mxu0 %v2290_v40 }
  0x46   :  { %2029 = vmatmul.mubr.bf16.gmra.mxu0 %v2275_v37 }
  0x48   :  { %2077 = vmatpush3.bf16.msra.mxu0 %v2290_v40 }
  0x49   :  { %2078 = vmatprep.subr.bf16.mxu0 %v2291_v41 }
  0x4c   :  { %2079 = vmatpush3.bf16.msra.mxu0 %v2291_v41 }
  0x4d   :  { %2128 = vmatprep.subr.bf16.mxu0 %v2474_v42 }
  0xee   :  { %v2018_v46 = vpop.f32.mrf.mxu0 }
  0xef   :  { %v302_v52 = vadd.f32 %v2018_v46, %v2456_v48  ;;  %v80_v46 = vld [vmem:[%s2765_s0 + $0x4c] sm:$0xf] }
  0xf0   :  { %v293_v47 = vpop.f32.mrf.mxu0  ;;  %113 = vst.msk [vmem:[#allocation2 + $0x4c] sm:$0xf] %vm93_vm0, %v80_v46 }
  0xf1   :  { %v294_v50 = vadd.f32 %v2456_v48, %v293_v47  ;;  %v358_v59 = vmax.f32 %v302_v52, 0.0  ;;  %v81_v47 = vld [vmem:[%s2765_s0 + $0x50] sm:$0xf]  ;;  %v85_v52 = vld [vmem:[%s2765_s0 + $0x60] sm:$0xf] }
  0xf2   :  { %v2019_v49 = vpop.f32.mrf.mxu0  ;;  %114 = vst.msk [vmem:[#allocation2 + $0x50] sm:$0xf] %vm93_vm0, %v81_v47  ;;  %118 = vst.msk [vmem:[#allocation2 + $0x60] sm:$0xf] %vm93_vm0, %v85_v52  ;;  %v2297_v52 = vld [vmem:[#allocation3 + $0x10] sm:$0xff]  }
  0xf3   :  { %v305_v51 = vadd.f32 %v2019_v49, %v2456_v48  ;;  %v356_v57 = vmax.f32 %v294_v50, 0.0  ;;  %v82_v49 = vld [vmem:[%s2765_s0 + $0x54] sm:$0xf]  ;;  %v83_v50 = vld [vmem:[%s2765_s0 + $0x58] sm:$0xf] }
  0xf4   :  { %v296_v53 = vpop.f32.mrf.mxu0  ;;  %115 = vst.msk [vmem:[#allocation2 + $0x54] sm:$0xf] %vm93_vm0, %v82_v49  ;;  %116 = vst.msk [vmem:[#allocation2 + $0x58] sm:$0xf] %vm93_vm0, %v83_v50 }
  0xf5   :  { %v297_v54 = vadd.f32 %v2456_v48, %v296_v53  ;;  %v359_v55 = vmax.f32 %v305_v51, 0.0  ;;  %v84_v51 = vld [vmem:[%s2765_s0 + $0x5c] sm:$0xf]  ;;  %v86_v53 = vld [vmem:[%s2765_s0 + $0x64] sm:$0xf] }
  0xf6   :  { %v2022_v56 = vpop.f32.mrf.mxu0  ;;  %117 = vst.msk [vmem:[#allocation2 + $0x5c] sm:$0xf] %vm93_vm0, %v84_v51  ;;  %119 = vst.msk [vmem:[#allocation2 + $0x64] sm:$0xf] %vm93_vm0, %v86_v53 }
  0xf7   :  { %v357_v58 = vmax.f32 %v297_v54, 0.0  ;;  %v373_v62 = vpack.c.bf16 %v359_v55, %v358_v59  ;;  %v318_v2 = vadd.f32 %v2022_v56, %v2456_v48  ;;  %v87_v54 = vld [vmem:[%s2765_s0 + $0x68] sm:$0xf]  ;;  %v88_v55 = vld [vmem:[%s2765_s0 + $0x6c] sm:$0xf] }
  0xf8   :  { %v309_v60 = vpop.f32.mrf.mxu0  ;;  %120 = vst.msk [vmem:[#allocation2 + $0x68] sm:$0xf] %vm93_vm0, %v87_v54  ;;  %121 = vst.msk [vmem:[#allocation2 + $0x6c] sm:$0xf] %vm93_vm0, %v88_v55  ;;  %v89_v56 = vld [vmem:[%s2765_s0 + $0x70] sm:$0xf] }
  0xf9   :  { %v372_v61 = vpack.c.bf16 %v357_v58, %v356_v57  ;;  %v310_v0 = vadd.f32 %v2456_v48, %v309_v60  ;;  %v362_v9 = vmax.f32 %v318_v2, 0.0  ;;  %v90_v57 = vld [vmem:[%s2765_s0 + $0x74] sm:$0xf]  ;;  %v91_v58 = vld [vmem:[%s2765_s0 + $0x78] sm:$0xf] }
  0xfa   :  { %v2023_v63 = vpop.f32.mrf.mxu0  ;;  %122 = vst.msk [vmem:[#allocation2 + $0x70] sm:$0xf] %vm93_vm0, %v89_v56  ;;  %123 = vst.msk [vmem:[#allocation2 + $0x74] sm:$0xf] %vm93_vm0, %v90_v57  ;;  %v92_v59 = vld [vmem:[%s2765_s0 + $0x7c] sm:$0xf] }
  0xfb   :  { %v321_v1 = vadd.f32 %v2023_v63, %v2456_v48  ;;  %2048 = vmatprep.mubr.bf16.mxu1 %v372_v61  ;;  %v360_v7 = vmax.f32 %v310_v0, 0.0  ;;  %124 = vst.msk [vmem:[#allocation2 + $0x78] sm:$0xf] %vm93_vm0, %v91_v58  ;;  %125 = vst.msk [vmem:[#allocation2 + $0x7c] sm:$0xf] %vm93_vm0, %v92_v59  ;;  %v2308_v60 = vld [vmem:[#allocation3 + $0xf8] sm:$0xff]  }
  0xfc   :  { %v312_v3 = vpop.f32.mrf.mxu0  ;;  %2049 = vmatmul.mubr.bf16.vlgmr.msra.gmra.mxu1 %v373_v62  ;;  %v2309_v61 = vld [vmem:[#allocation3 + $0xf0] sm:$0xff]   ;;  %2096 = vmatprep.subr.bf16.mxu1 %v2308_v60  ;;  %v2310_v62 = vld [vmem:[#allocation3 + $0xe8] sm:$0xff]   ;;  %v2311_v63 = vld [vmem:[#allocation3 + $0xe0] sm:$0xff]  }
  0xfd   :  { %v313_v4 = vadd.f32 %v2456_v48, %v312_v3  ;;  %v363_v5 = vmax.f32 %v321_v1, 0.0  ;;  %2097 = vmatpush3.bf16.msra.mxu1 %v2308_v60  ;;  %v2312_v0 = vld [vmem:[#allocation3 + $0xd8] sm:$0xff]   ;;  %v2544_v3 = vld [vmem:[%s2767_s2 + $0x1] ss:$0 sm:$0xff]  ;;  %v2298_v59 = vld [vmem:[#allocation3 + $0x8] sm:$0xff]  }
  0xfe   :  { %v2026_v6 = vpop.f32.mrf.mxu0  ;;  %2098 = vmatprep.subr.bf16.mxu1 %v2309_v61 }
  0xff   :  { %v361_v8 = vmax.f32 %v313_v4, 0.0  ;;  %v375_v12 = vpack.c.bf16 %v363_v5, %v362_v9  ;;  %v334_v16 = vadd.f32 %v2026_v6, %v2456_v48 }
 0x100   :  { %v325_v10 = vpop.f32.mrf.mxu0 }
 0x101   :  { %v374_v11 = vpack.c.bf16 %v361_v8, %v360_v7  ;;  %v326_v14 = vadd.f32 %v2456_v48, %v325_v10  ;;  %v366_v23 = vmax.f32 %v334_v16, 0.0  ;;  %2099 = vmatpush3.bf16.msra.mxu1 %v2309_v61 }
 0x102   :  { %v2027_v13 = vpop.f32.mrf.mxu0  ;;  %2100 = vmatprep.subr.bf16.mxu1 %v2310_v62 }
 0x103   :  { %v337_v15 = vadd.f32 %v2027_v13, %v2456_v48  ;;  %2052 = vmatprep.mubr.bf16.mxu1 %v374_v11  ;;  %v364_v21 = vmax.f32 %v326_v14, 0.0 }
 0x104   :  { %v328_v17 = vpop.f32.mrf.mxu0  ;;  %2053 = vmatmul.mubr.bf16.gmra.mxu1 %v375_v12 }
 0x105   :  { %v329_v18 = vadd.f32 %v2456_v48, %v328_v17  ;;  %v367_v19 = vmax.f32 %v337_v15, 0.0  ;;  %2101 = vmatpush3.bf16.msra.mxu1 %v2310_v62 }
 0x106   :  { %v2030_v20 = vpop.f32.mrf.mxu0  ;;  %2102 = vmatprep.subr.bf16.mxu1 %v2311_v63 }
 0x107   :  { %v365_v22 = vmax.f32 %v329_v18, 0.0  ;;  %v377_v26 = vpack.c.bf16 %v367_v19, %v366_v23  ;;  %v350_v30 = vadd.f32 %v2030_v20, %v2456_v48  ;;  %v2293_v19 = vld [vmem:[#allocation3 + $0x30] sm:$0xff]  }
 0x108   :  { %v341_v24 = vpop.f32.mrf.mxu0 }
 0x109   :  { %v376_v25 = vpack.c.bf16 %v365_v22, %v364_v21  ;;  %v342_v28 = vadd.f32 %v2456_v48, %v341_v24  ;;  %v370_v36 = vmax.f32 %v350_v30, 0.0  ;;  %2103 = vmatpush3.bf16.msra.mxu1 %v2311_v63 }
 0x10a   :  { %v2031_v27 = vpop.f32.mrf.mxu0  ;;  %2104 = vmatprep.subr.bf16.mxu1 %v2312_v0 }
 0x10b   :  { %v353_v29 = vadd.f32 %v2031_v27, %v2456_v48  ;;  %2056 = vmatprep.mubr.bf16.mxu1 %v376_v25  ;;  %v368_v34 = vmax.f32 %v342_v28, 0.0  ;;  %v2294_v27 = vld [vmem:[#allocation3 + $0x28] sm:$0xff]  }
 0x10c   :  { %v344_v31 = vpop.f32.mrf.mxu0  ;;  %2057 = vmatmul.mubr.bf16.gmra.mxu1 %v377_v26 }
 0x10d   :  { %v345_v32 = vadd.f32 %v2456_v48, %v344_v31  ;;  %v371_v33 = vmax.f32 %v353_v29, 0.0  ;;  %2105 = vmatpush3.bf16.msra.mxu1 %v2312_v0  ;;  %v2300_v0 = vld [vmem:[#allocation2 + $0x40] sm:$0xff]  }
 0x10f   :  { %v369_v35 = vmax.f32 %v345_v32, 0.0  ;;  %v379_v38 = vpack.c.bf16 %v371_v33, %v370_v36 }
 0x111   :  { %v378_v37 = vpack.c.bf16 %v369_v35, %v368_v34  ;;  %v2295_v35 = vld [vmem:[#allocation3 + $0x20] sm:$0xff]  }
 0x113   :  { %2060 = vmatprep.mubr.bf16.mxu1 %v378_v37 }
 0x114   :  { %2061 = vmatmul.mubr.bf16.gmra.mxu1 %v379_v38 }
 0x1bc   :  { %v2050_v1 = vpop.f32.mrf.mxu1 }
 0x1bd   :  { %v493_v7 = vadd.f32 %v2050_v1, %v2544_v3 }
 0x1be   :  { %v484_v2 = vpop.f32.mrf.mxu1 }
 0x1bf   :  { %v485_v5 = vadd.f32 %v2544_v3, %v484_v2  ;;  %v549_v14 = vmax.f32 %v493_v7, 0.0  ;;  %v2299_v2 = vld [vmem:[#allocation3] sm:$0xff]  }
 0x1c0   :  { %v2051_v4 = vpop.f32.mrf.mxu1  ;;  %v2304_v7 = vld [vmem:[#allocation2 + $0x60] sm:$0xff]  }
 0x1c1   :  { %v496_v6 = vadd.f32 %v2051_v4, %v2544_v3  ;;  %v547_v12 = vmax.f32 %v485_v5, 0.0  ;;  %v2301_v4 = vld [vmem:[#allocation2 + $0x48] sm:$0xff]   ;;  %v2302_v5 = vld [vmem:[#allocation2 + $0x50] sm:$0xff]  }
 0x1c2   :  { %v487_v8 = vpop.f32.mrf.mxu1 }
 0x1c3   :  { %v488_v9 = vadd.f32 %v2544_v3, %v487_v8  ;;  %v550_v10 = vmax.f32 %v496_v6, 0.0  ;;  %v2303_v6 = vld [vmem:[#allocation2 + $0x58] sm:$0xff]   ;;  %v2305_v8 = vld [vmem:[#allocation2 + $0x68] sm:$0xff]  }
 0x1c4   :  { %v2054_v11 = vpop.f32.mrf.mxu1 }
 0x1c5   :  { %v548_v13 = vmax.f32 %v488_v9, 0.0  ;;  %v564_v17 = vpack.c.bf16 %v550_v10, %v549_v14  ;;  %v509_v22 = vadd.f32 %v2054_v11, %v2544_v3  ;;  %v2306_v9 = vld [vmem:[#allocation2 + $0x70] sm:$0xff]   ;;  %v2307_v10 = vld [vmem:[#allocation2 + $0x78] sm:$0xff]  }
 0x1c6   :  { %v500_v15 = vpop.f32.mrf.mxu1  ;;  %v2313_v11 = vld [vmem:[#allocation3 + $0xd0] sm:$0xff]   ;;  %v2316_v14 = vld [vmem:[#allocation3 + $0x78] sm:$0xff]  }
 0x1c7   :  { %v563_v16 = vpack.c.bf16 %v548_v13, %v547_v12  ;;  %v501_v20 = vadd.f32 %v2544_v3, %v500_v15  ;;  %v553_v30 = vmax.f32 %v509_v22, 0.0  ;;  %2106 = vmatprep.subr.bf16.mxu1 %v2313_v11  ;;  %v2314_v12 = vld [vmem:[#allocation3 + $0xc8] sm:$0xff]   ;;  %v2315_v13 = vld [vmem:[#allocation3 + $0xc0] sm:$0xff]  }
 0x1c8   :  { %v2055_v18 = vpop.f32.mrf.mxu1  ;;  %2107 = vmatpush3.bf16.msra.mxu1 %v2313_v11  ;;  %v2322_v11 = vld [vmem:[#allocation3 + $0x48] sm:$0xff]  }
 0x1c9   :  { %v512_v21 = vadd.f32 %v2055_v18, %v2544_v3  ;;  %2080 = vmatprep.mubr.bf16.mxu0 %v563_v16  ;;  %v551_v28 = vmax.f32 %v501_v20, 0.0  ;;  %2108 = vmatprep.subr.bf16.mxu1 %v2314_v12 }
 0x1ca   :  { %v503_v23 = vpop.f32.mrf.mxu1  ;;  %2081 = vmatmul.mubr.bf16.vlgmr.msra.gmra.mxu0 %v564_v17  ;;  %v2566_v17 = vld [vmem:[%s2767_s2 + $0x2] ss:$0 sm:$0xff] }
 0x1cb   :  { %v504_v24 = vadd.f32 %v2544_v3, %v503_v23  ;;  %2129 = vmatpush3.bf16.msra.mxu0 %v2474_v42  ;;  %v554_v25 = vmax.f32 %v512_v21, 0.0 }
 0x1cc   :  { %v2058_v26 = vpop.f32.mrf.mxu1  ;;  %2130 = vmatprep.subr.bf16.mxu0 %v2293_v19  ;;  %2109 = vmatpush3.bf16.msra.mxu1 %v2314_v12 }
 0x1cd   :  { %v552_v29 = vmax.f32 %v504_v24, 0.0  ;;  %v566_v33 = vpack.c.bf16 %v554_v25, %v553_v30  ;;  %v525_v38 = vadd.f32 %v2058_v26, %v2544_v3  ;;  %2110 = vmatprep.subr.bf16.mxu1 %v2315_v13 }
 0x1ce   :  { %v516_v31 = vpop.f32.mrf.mxu1 }
 0x1cf   :  { %v565_v32 = vpack.c.bf16 %v552_v29, %v551_v28  ;;  %2131 = vmatpush3.bf16.msra.mxu0 %v2293_v19  ;;  %v517_v36 = vadd.f32 %v2544_v3, %v516_v31  ;;  %v557_v46 = vmax.f32 %v525_v38, 0.0 }
 0x1d0   :  { %v2059_v34 = vpop.f32.mrf.mxu1  ;;  %2132 = vmatprep.subr.bf16.mxu0 %v2294_v27  ;;  %2111 = vmatpush3.bf16.msra.mxu1 %v2315_v13 }
 0x1d1   :  { %v528_v37 = vadd.f32 %v2059_v34, %v2544_v3  ;;  %2084 = vmatprep.mubr.bf16.mxu0 %v565_v32  ;;  %v555_v44 = vmax.f32 %v517_v36, 0.0  ;;  %2160 = vmatprep.subr.bf16.mxu1 %v2316_v14 }
 0x1d2   :  { %v519_v39 = vpop.f32.mrf.mxu1  ;;  %2085 = vmatmul.mubr.bf16.gmra.mxu0 %v566_v33  ;;  %v2317_v33 = vld [vmem:[#allocation3 + $0x70] sm:$0xff]  }
 0x1d3   :  { %v520_v40 = vadd.f32 %v2544_v3, %v519_v39  ;;  %2133 = vmatpush3.bf16.msra.mxu0 %v2294_v27  ;;  %v558_v41 = vmax.f32 %v528_v37, 0.0 }
 0x1d4   :  { %v2062_v42 = vpop.f32.mrf.mxu1  ;;  %2134 = vmatprep.subr.bf16.mxu0 %v2295_v35 }
 0x1d5   :  { %v556_v45 = vmax.f32 %v520_v40, 0.0  ;;  %v568_v50 = vpack.c.bf16 %v558_v41, %v557_v46  ;;  %v541_v55 = vadd.f32 %v2062_v42, %v2544_v3  ;;  %v2318_v41 = vld [vmem:[#allocation3 + $0x68] sm:$0xff]  }
 0x1d6   :  { %v532_v47 = vpop.f32.mrf.mxu1 }
 0x1d7   :  { %v567_v49 = vpack.c.bf16 %v556_v45, %v555_v44  ;;  %2135 = vmatpush3.bf16.msra.mxu0 %v2295_v35  ;;  %v533_v53 = vadd.f32 %v2544_v3, %v532_v47  ;;  %v561_v62 = vmax.f32 %v541_v55, 0.0 }
 0x1d8   :  { %v2063_v51 = vpop.f32.mrf.mxu1  ;;  %2136 = vmatprep.subr.bf16.mxu0 %v2296_v43 }
 0x1d9   :  { %v544_v54 = vadd.f32 %v2063_v51, %v2544_v3  ;;  %2088 = vmatprep.mubr.bf16.mxu0 %v567_v49  ;;  %v559_v60 = vmax.f32 %v533_v53, 0.0 }
 0x1da   :  { %v535_v56 = vpop.f32.mrf.mxu1  ;;  %2089 = vmatmul.mubr.bf16.gmra.mxu0 %v568_v50  ;;  %v2319_v50 = vld [vmem:[#allocation3 + $0x60] sm:$0xff]  }
 0x1db   :  { %v536_v57 = vadd.f32 %v2544_v3, %v535_v56  ;;  %2137 = vmatpush3.bf16.msra.mxu0 %v2296_v43  ;;  %v562_v58 = vmax.f32 %v544_v54, 0.0 }
 0x1dc   :  { %2138 = vmatprep.subr.bf16.mxu0 %v2297_v52 }
 0x1dd   :  { %v560_v61 = vmax.f32 %v536_v57, 0.0  ;;  %v570_v1 = vpack.c.bf16 %v562_v58, %v561_v62  ;;  %v2320_v58 = vld [vmem:[#allocation3 + $0x58] sm:$0xff]  }
 0x1df   :  { %v569_v63 = vpack.c.bf16 %v560_v61, %v559_v60  ;;  %2139 = vmatpush3.bf16.msra.mxu0 %v2297_v52 }
 0x1e0   :  { %2140 = vmatprep.subr.bf16.mxu0 %v2298_v59 }
 0x1e1   :  { %2092 = vmatprep.mubr.bf16.mxu0 %v569_v63 }
 0x1e2   :  { %2093 = vmatmul.mubr.bf16.gmra.mxu0 %v570_v1 }
 0x1e3   :  { %2141 = vmatpush3.bf16.msra.mxu0 %v2298_v59  ;;  %2144 = vmatprep.mubr.bf16.mxu0 %v2300_v0 }
 0x1e4   :  { %2142 = vmatprep.subr.bf16.mxu0 %v2299_v2 }
 0x1e7   :  { %2143 = vmatpush3.bf16.msra.mxu0 %v2299_v2  ;;  %v2321_v2 = vld [vmem:[#allocation3 + $0x50] sm:$0xff]  }
 0x1ea   :  { %2145 = vmatmul.mubr.bf16.vlgmr.msra.gmra.mxu0 %v2301_v4 }
 0x1eb   :  { %2148 = vmatprep.mubr.bf16.mxu0 %v2302_v5 }
 0x1f2   :  { %2149 = vmatmul.mubr.bf16.gmra.mxu0 %v2303_v6 }
 0x1f3   :  { %2152 = vmatprep.mubr.bf16.mxu0 %v2304_v7 }
 0x1fa   :  { %2153 = vmatmul.mubr.bf16.gmra.mxu0 %v2305_v8 }
 0x1fb   :  { %2156 = vmatprep.mubr.bf16.mxu0 %v2306_v9 }
 0x202   :  { %2157 = vmatmul.mubr.bf16.gmra.mxu0 %v2307_v10 }
 0x28a   :  { %v2082_v15 = vpop.f32.mrf.mxu0 }
 0x28b   :  { %v684_v21 = vadd.f32 %v2082_v15, %v2566_v17 }
 0x28c   :  { %v675_v16 = vpop.f32.mrf.mxu0 }
 0x28d   :  { %v676_v19 = vadd.f32 %v2566_v17, %v675_v16  ;;  %v740_v28 = vmax.f32 %v684_v21, 0.0 }
 0x28e   :  { %v2083_v18 = vpop.f32.mrf.mxu0 }
 0x28f   :  { %v687_v20 = vadd.f32 %v2083_v18, %v2566_v17  ;;  %v738_v26 = vmax.f32 %v676_v19, 0.0 }
 0x290   :  { %v678_v22 = vpop.f32.mrf.mxu0 }
 0x291   :  { %v679_v23 = vadd.f32 %v2566_v17, %v678_v22  ;;  %v741_v24 = vmax.f32 %v687_v20, 0.0  ;;  %v2323_v20 = vld [vmem:[#allocation3 + $0x40] sm:$0xff]  }
 0x292   :  { %v2086_v25 = vpop.f32.mrf.mxu0 }
 0x293   :  { %v739_v27 = vmax.f32 %v679_v23, 0.0  ;;  %v755_v31 = vpack.c.bf16 %v741_v24, %v740_v28  ;;  %v700_v36 = vadd.f32 %v2086_v25, %v2566_v17 }
 0x294   :  { %v691_v29 = vpop.f32.mrf.mxu0 }
 0x295   :  { %v754_v30 = vpack.c.bf16 %v739_v27, %v738_v26  ;;  %v692_v34 = vadd.f32 %v2566_v17, %v691_v29  ;;  %v744_v44 = vmax.f32 %v700_v36, 0.0 }
 0x296   :  { %v2087_v32 = vpop.f32.mrf.mxu0 }
 0x297   :  { %v703_v35 = vadd.f32 %v2087_v32, %v2566_v17  ;;  %2112 = vmatprep.mubr.bf16.mxu1 %v754_v30  ;;  %v742_v42 = vmax.f32 %v692_v34, 0.0 }
 0x298   :  { %v694_v37 = vpop.f32.mrf.mxu0  ;;  %2113 = vmatmul.mubr.bf16.vlgmr.msra.gmra.mxu1 %v755_v31 }
 0x299   :  { %v695_v38 = vadd.f32 %v2566_v17, %v694_v37  ;;  %2161 = vmatpush3.bf16.msra.mxu1 %v2316_v14  ;;  %v745_v39 = vmax.f32 %v703_v35, 0.0 }
 0x29a   :  { %v2090_v40 = vpop.f32.mrf.mxu0  ;;  %2162 = vmatprep.subr.bf16.mxu1 %v2317_v33 }
 0x29b   :  { %v743_v43 = vmax.f32 %v695_v38, 0.0  ;;  %v757_v47 = vpack.c.bf16 %v745_v39, %v744_v44  ;;  %v716_v53 = vadd.f32 %v2090_v40, %v2566_v17 }
 0x29c   :  { %v707_v45 = vpop.f32.mrf.mxu0 }
 0x29d   :  { %v756_v46 = vpack.c.bf16 %v743_v43, %v742_v42  ;;  %2163 = vmatpush3.bf16.msra.mxu1 %v2317_v33  ;;  %v708_v51 = vadd.f32 %v2566_v17, %v707_v45  ;;  %v748_v61 = vmax.f32 %v716_v53, 0.0 }
 0x29e   :  { %v2091_v49 = vpop.f32.mrf.mxu0  ;;  %2164 = vmatprep.subr.bf16.mxu1 %v2318_v41 }
 0x29f   :  { %v719_v52 = vadd.f32 %v2091_v49, %v2566_v17  ;;  %2116 = vmatprep.mubr.bf16.mxu1 %v756_v46  ;;  %v746_v59 = vmax.f32 %v708_v51, 0.0 }
 0x2a0   :  { %v710_v54 = vpop.f32.mrf.mxu0  ;;  %2117 = vmatmul.mubr.bf16.gmra.mxu1 %v757_v47 }
 0x2a1   :  { %v711_v55 = vadd.f32 %v2566_v17, %v710_v54  ;;  %2165 = vmatpush3.bf16.msra.mxu1 %v2318_v41  ;;  %v749_v56 = vmax.f32 %v719_v52, 0.0 }
 0x2a2   :  { %v2094_v57 = vpop.f32.mrf.mxu0  ;;  %2166 = vmatprep.subr.bf16.mxu1 %v2319_v50 }
 0x2a3   :  { %v747_v60 = vmax.f32 %v711_v55, 0.0  ;;  %v759_v0 = vpack.c.bf16 %v749_v56, %v748_v61  ;;  %v732_v6 = vadd.f32 %v2094_v57, %v2566_v17 }
 0x2a4   :  { %v723_v62 = vpop.f32.mrf.mxu0 }
 0x2a5   :  { %v758_v63 = vpack.c.bf16 %v747_v60, %v746_v59  ;;  %2167 = vmatpush3.bf16.msra.mxu1 %v2319_v50  ;;  %v724_v4 = vadd.f32 %v2566_v17, %v723_v62  ;;  %v752_v14 = vmax.f32 %v732_v6, 0.0 }
 0x2a6   :  { %v2095_v1 = vpop.f32.mrf.mxu0  ;;  %2168 = vmatprep.subr.bf16.mxu1 %v2320_v58 }
 0x2a7   :  { %v735_v5 = vadd.f32 %v2095_v1, %v2566_v17  ;;  %2120 = vmatprep.mubr.bf16.mxu1 %v758_v63  ;;  %v750_v12 = vmax.f32 %v724_v4, 0.0 }
 0x2a8   :  { %v726_v7 = vpop.f32.mrf.mxu0  ;;  %2121 = vmatmul.mubr.bf16.gmra.mxu1 %v759_v0 }
 0x2a9   :  { %v727_v8 = vadd.f32 %v2566_v17, %v726_v7  ;;  %2169 = vmatpush3.bf16.msra.mxu1 %v2320_v58  ;;  %v753_v9 = vmax.f32 %v735_v5, 0.0 }
 0x2aa   :  { %v2146_v10 = vpop.f32.mrf.mxu0  ;;  %2170 = vmatprep.subr.bf16.mxu1 %v2321_v2 }
 0x2ab   :  { %v751_v13 = vmax.f32 %v727_v8, 0.0  ;;  %v761_v18 = vpack.c.bf16 %v753_v9, %v752_v14  ;;  %v1122_v23 = vadd.f32 %v2146_v10, %v2456_v48  ;;  %v2326_v14 = vld [vmem:[#allocation3 + $0xa8] sm:$0xff]  }
 0x2ac   :  { %v1113_v15 = vpop.f32.mrf.mxu0 }
 0x2ad   :  { %v760_v16 = vpack.c.bf16 %v751_v13, %v750_v12  ;;  %2171 = vmatpush3.bf16.msra.mxu1 %v2321_v2  ;;  %v1114_v21 = vadd.f32 %v2456_v48, %v1113_v15  ;;  %v1178_v30 = vmax.f32 %v1122_v23, 0.0  ;;  %v2324_v12 = vld [vmem:[#allocation3 + $0xb8] sm:$0xff]   ;;  %v2325_v13 = vld [vmem:[#allocation3 + $0xb0] sm:$0xff]   ;;  %v2327_v15 = vld [vmem:[#allocation3 + $0xa0] sm:$0xff]  }
 0x2ae   :  { %v2147_v19 = vpop.f32.mrf.mxu0  ;;  %2172 = vmatprep.subr.bf16.mxu1 %v2322_v11  ;;  %2192 = vmatprep.subr.bf16.mxu0 %v2324_v12  ;;  %v2335_v23 = vld [vmem:[#allocation3 + $0xe0] sm:$0xff]  }
 0x2af   :  { %v1125_v22 = vadd.f32 %v2147_v19, %v2456_v48  ;;  %2124 = vmatprep.mubr.bf16.mxu1 %v760_v16  ;;  %v1176_v28 = vmax.f32 %v1114_v21, 0.0  ;;  %2193 = vmatpush3.bf16.msra.mxu0 %v2324_v12  ;;  %v2329_v16 = vld [vmem:[#allocation3 + $0x90] sm:$0xff]   ;;  %v2331_v19 = vld [vmem:[#allocation3 + $0x80] sm:$0xff]  }
 0x2b0   :  { %2125 = vmatmul.mubr.bf16.gmra.mxu1 %v761_v18  ;;  %v1116_v24 = vpop.f32.mrf.mxu0  ;;  %2194 = vmatprep.subr.bf16.mxu0 %v2325_v13  ;;  %v2330_v18 = vld [vmem:[#allocation3 + $0x88] sm:$0xff]   ;;  %v2333_v21 = vld [vmem:[#allocation3 + $0xf0] sm:$0xff]  }
 0x2b1   :  { %v1117_v25 = vadd.f32 %v2456_v48, %v1116_v24  ;;  %2173 = vmatpush3.bf16.msra.mxu1 %v2322_v11  ;;  %v1179_v26 = vmax.f32 %v1125_v22, 0.0  ;;  %v2334_v22 = vld [vmem:[#allocation3 + $0xe8] sm:$0xff]   ;;  %v2336_v24 = vld [vmem:[#allocation3 + $0xd8] sm:$0xff]  }
 0x2b2   :  { %v2150_v27 = vpop.f32.mrf.mxu0  ;;  %2174 = vmatprep.subr.bf16.mxu1 %v2323_v20 }
 0x2b3   :  { %v1177_v29 = vmax.f32 %v1117_v25, 0.0  ;;  %v1193_v33 = vpack.c.bf16 %v1179_v26, %v1178_v30  ;;  %v1138_v37 = vadd.f32 %v2150_v27, %v2456_v48  ;;  %2195 = vmatpush3.bf16.msra.mxu0 %v2325_v13  ;;  %v2603_v25 = vld [vmem:[%s2767_s2 + $0x3] ss:$0 sm:$0xff] }
 0x2b4   :  { %v1129_v31 = vpop.f32.mrf.mxu0  ;;  %2196 = vmatprep.subr.bf16.mxu0 %v2326_v14 }
 0x2b5   :  { %v1192_v32 = vpack.c.bf16 %v1177_v29, %v1176_v28  ;;  %2175 = vmatpush3.bf16.msra.mxu1 %v2323_v20  ;;  %v1130_v35 = vadd.f32 %v2456_v48, %v1129_v31  ;;  %v1182_v44 = vmax.f32 %v1138_v37, 0.0  ;;  %v2332_v20 = vld [vmem:[#allocation3 + $0xf8] sm:$0xff]  }
 0x2b6   :  { %v2151_v34 = vpop.f32.mrf.mxu0  ;;  %2224 = vmatprep.subr.bf16.mxu1 %v2332_v20 }
 0x2b7   :  { %v1141_v36 = vadd.f32 %v2151_v34, %v2456_v48  ;;  %2176 = vmatprep.mubr.bf16.mxu1 %v1192_v32  ;;  %v1180_v42 = vmax.f32 %v1130_v35, 0.0  ;;  %2197 = vmatpush3.bf16.msra.mxu0 %v2326_v14 }
 0x2b8   :  { %v1132_v38 = vpop.f32.mrf.mxu0  ;;  %2177 = vmatmul.mubr.bf16.vlgmr.msra.gmra.mxu1 %v1193_v33  ;;  %2198 = vmatprep.subr.bf16.mxu0 %v2327_v15 }
 0x2b9   :  { %v1133_v39 = vadd.f32 %v2456_v48, %v1132_v38  ;;  %v1183_v40 = vmax.f32 %v1141_v36, 0.0  ;;  %2225 = vmatpush3.bf16.msra.mxu1 %v2332_v20 }
 0x2ba   :  { %v2154_v41 = vpop.f32.mrf.mxu0  ;;  %2226 = vmatprep.subr.bf16.mxu1 %v2333_v21 }
 0x2bb   :  { %v1181_v43 = vmax.f32 %v1133_v39, 0.0  ;;  %v1195_v47 = vpack.c.bf16 %v1183_v40, %v1182_v44  ;;  %v1154_v52 = vadd.f32 %v2154_v41, %v2456_v48  ;;  %2199 = vmatpush3.bf16.msra.mxu0 %v2327_v15 }
 0x2bc   :  { %v1145_v45 = vpop.f32.mrf.mxu0 }
 0x2bd   :  { %v1194_v46 = vpack.c.bf16 %v1181_v43, %v1180_v42  ;;  %v1146_v50 = vadd.f32 %v2456_v48, %v1145_v45  ;;  %v1186_v59 = vmax.f32 %v1154_v52, 0.0  ;;  %2227 = vmatpush3.bf16.msra.mxu1 %v2333_v21 }
 0x2be   :  { %v2155_v49 = vpop.f32.mrf.mxu0  ;;  %2228 = vmatprep.subr.bf16.mxu1 %v2334_v22 }
 0x2bf   :  { %v1157_v51 = vadd.f32 %v2155_v49, %v2456_v48  ;;  %2180 = vmatprep.mubr.bf16.mxu1 %v1194_v46  ;;  %v1184_v57 = vmax.f32 %v1146_v50, 0.0 }
 0x2c0   :  { %v1148_v53 = vpop.f32.mrf.mxu0  ;;  %2181 = vmatmul.mubr.bf16.gmra.mxu1 %v1195_v47 }
 0x2c1   :  { %v1149_v54 = vadd.f32 %v2456_v48, %v1148_v53  ;;  %v1187_v55 = vmax.f32 %v1157_v51, 0.0  ;;  %2229 = vmatpush3.bf16.msra.mxu1 %v2334_v22 }
 0x2c2   :  { %v2158_v56 = vpop.f32.mrf.mxu0  ;;  %2230 = vmatprep.subr.bf16.mxu1 %v2335_v23 }
 0x2c3   :  { %v1185_v58 = vmax.f32 %v1149_v54, 0.0  ;;  %v1197_v62 = vpack.c.bf16 %v1187_v55, %v1186_v59  ;;  %v1170_v2 = vadd.f32 %v2158_v56, %v2456_v48 }
 0x2c4   :  { %v1161_v60 = vpop.f32.mrf.mxu0 }
 0x2c5   :  { %v1196_v61 = vpack.c.bf16 %v1185_v58, %v1184_v57  ;;  %v1162_v0 = vadd.f32 %v2456_v48, %v1161_v60  ;;  %v1190_v9 = vmax.f32 %v1170_v2, 0.0  ;;  %2231 = vmatpush3.bf16.msra.mxu1 %v2335_v23 }
 0x2c6   :  { %v2159_v63 = vpop.f32.mrf.mxu0  ;;  %2232 = vmatprep.subr.bf16.mxu1 %v2336_v24 }
 0x2c7   :  { %v1173_v1 = vadd.f32 %v2159_v63, %v2456_v48  ;;  %2184 = vmatprep.mubr.bf16.mxu1 %v1196_v61  ;;  %v1188_v7 = vmax.f32 %v1162_v0, 0.0 }
 0x2c8   :  { %v1164_v4 = vpop.f32.mrf.mxu0  ;;  %2185 = vmatmul.mubr.bf16.gmra.mxu1 %v1197_v62 }
 0x2c9   :  { %v1165_v5 = vadd.f32 %v2456_v48, %v1164_v4  ;;  %v1191_v6 = vmax.f32 %v1173_v1, 0.0  ;;  %v2328_v48 = vld [vmem:[#allocation3 + $0x98] sm:$0xff]   ;;  %2233 = vmatpush3.bf16.msra.mxu1 %v2336_v24 }
 0x2ca   :  { %2200 = vmatprep.subr.bf16.mxu0 %v2328_v48 }
 0x2cb   :  { %v1189_v8 = vmax.f32 %v1165_v5, 0.0  ;;  %v1199_v11 = vpack.c.bf16 %v1191_v6, %v1190_v9  ;;  %2201 = vmatpush3.bf16.msra.mxu0 %v2328_v48 }
 0x2cc   :  { %2202 = vmatprep.subr.bf16.mxu0 %v2329_v16 }
 0x2cd   :  { %v1198_v10 = vpack.c.bf16 %v1189_v8, %v1188_v7 }
 0x2cf   :  { %2188 = vmatprep.mubr.bf16.mxu1 %v1198_v10  ;;  %2203 = vmatpush3.bf16.msra.mxu0 %v2329_v16 }
 0x2d0   :  { %2189 = vmatmul.mubr.bf16.gmra.mxu1 %v1199_v11  ;;  %2204 = vmatprep.subr.bf16.mxu0 %v2330_v18 }
 0x2d3   :  { %2205 = vmatpush3.bf16.msra.mxu0 %v2330_v18 }
 0x2d4   :  { %2206 = vmatprep.subr.bf16.mxu0 %v2331_v19 }
 0x2d7   :  { %2207 = vmatpush3.bf16.msra.mxu0 %v2331_v19 }
 0x358   :  { %v2114_v26 = vpop.f32.mrf.mxu1 }
 0x359   :  { %v875_v27 = vadd.f32 %v2114_v26, %v2603_v25 }
 0x35a   :  { %v866_v28 = vpop.f32.mrf.mxu1 }
 0x35b   :  { %931 = vst [vmem:[%s2768_s3 + $0x10] sm:$0xff] %v875_v27  ;;  %v867_v29 = vadd.f32 %v2603_v25, %v866_v28 }
 0x35c   :  { %v2115_v30 = vpop.f32.mrf.mxu1 }
 0x35d   :  { %929 = vst [vmem:[%s2768_s3] sm:$0xff] %v867_v29  ;;  %v878_v31 = vadd.f32 %v2115_v30, %v2603_v25 }
 0x35e   :  { %v869_v32 = vpop.f32.mrf.mxu1 }
 0x35f   :  { %932 = vst [vmem:[%s2768_s3 + $0x18] sm:$0xff] %v878_v31  ;;  %v870_v33 = vadd.f32 %v2603_v25, %v869_v32 }
 0x360   :  { %v2118_v34 = vpop.f32.mrf.mxu1 }
 0x361   :  { %930 = vst [vmem:[%s2768_s3 + $0x8] sm:$0xff] %v870_v33  ;;  %v891_v35 = vadd.f32 %v2118_v34, %v2603_v25 }
 0x362   :  { %v882_v36 = vpop.f32.mrf.mxu1 }
 0x363   :  { %935 = vst [vmem:[%s2768_s3 + $0x30] sm:$0xff] %v891_v35  ;;  %v883_v37 = vadd.f32 %v2603_v25, %v882_v36 }
 0x364   :  { %v2119_v38 = vpop.f32.mrf.mxu1 }
 0x365   :  { %933 = vst [vmem:[%s2768_s3 + $0x20] sm:$0xff] %v883_v37  ;;  %v894_v39 = vadd.f32 %v2119_v38, %v2603_v25 }
 0x366   :  { %v885_v40 = vpop.f32.mrf.mxu1 }
 0x367   :  { %936 = vst [vmem:[%s2768_s3 + $0x38] sm:$0xff] %v894_v39  ;;  %v886_v41 = vadd.f32 %v2603_v25, %v885_v40 }
 0x368   :  { %v2122_v42 = vpop.f32.mrf.mxu1 }
 0x369   :  { %934 = vst [vmem:[%s2768_s3 + $0x28] sm:$0xff] %v886_v41  ;;  %v907_v43 = vadd.f32 %v2122_v42, %v2603_v25 }
 0x36a   :  { %v898_v44 = vpop.f32.mrf.mxu1 }
 0x36b   :  { %939 = vst [vmem:[%s2768_s3 + $0x50] sm:$0xff] %v907_v43  ;;  %v899_v45 = vadd.f32 %v2603_v25, %v898_v44 }
 0x36c   :  { %v2123_v46 = vpop.f32.mrf.mxu1 }
 0x36d   :  { %937 = vst [vmem:[%s2768_s3 + $0x40] sm:$0xff] %v899_v45  ;;  %v910_v47 = vadd.f32 %v2123_v46, %v2603_v25 }
 0x36e   :  { %v901_v49 = vpop.f32.mrf.mxu1 }
 0x36f   :  { %940 = vst [vmem:[%s2768_s3 + $0x58] sm:$0xff] %v910_v47  ;;  %v902_v50 = vadd.f32 %v2603_v25, %v901_v49 }
 0x370   :  { %v2126_v51 = vpop.f32.mrf.mxu1 }
 0x371   :  { %938 = vst [vmem:[%s2768_s3 + $0x48] sm:$0xff] %v902_v50  ;;  %v923_v52 = vadd.f32 %v2126_v51, %v2603_v25 }
 0x372   :  { %v914_v53 = vpop.f32.mrf.mxu1 }
 0x373   :  { %943 = vst [vmem:[%s2768_s3 + $0x70] sm:$0xff] %v923_v52  ;;  %v915_v54 = vadd.f32 %v2603_v25, %v914_v53 }
 0x374   :  { %v2127_v55 = vpop.f32.mrf.mxu1 }
 0x375   :  { %941 = vst [vmem:[%s2768_s3 + $0x60] sm:$0xff] %v915_v54  ;;  %v926_v56 = vadd.f32 %v2127_v55, %v2603_v25  ;;  %v2337_v54 = vld [vmem:[#allocation3 + $0xd0] sm:$0xff]   ;;  %v2338_v55 = vld [vmem:[#allocation3 + $0xc8] sm:$0xff]  }
 0x376   :  { %v917_v57 = vpop.f32.mrf.mxu1  ;;  %2234 = vmatprep.subr.bf16.mxu1 %v2337_v54 }
 0x377   :  { %944 = vst [vmem:[%s2768_s3 + $0x78] sm:$0xff] %v926_v56  ;;  %v918_v58 = vadd.f32 %v2603_v25, %v917_v57  ;;  %2235 = vmatpush3.bf16.msra.mxu1 %v2337_v54  ;;  %v2339_v56 = vld [vmem:[#allocation3 + $0xc0] sm:$0xff]  }
 0x378   :  { %v2178_v59 = vpop.f32.mrf.mxu1  ;;  %2236 = vmatprep.subr.bf16.mxu1 %v2338_v55 }
 0x379   :  { %942 = vst [vmem:[%s2768_s3 + $0x68] sm:$0xff] %v918_v58  ;;  %v1312_v0 = vadd.f32 %v2178_v59, %v2544_v3 }
 0x37a   :  { %v1303_v60 = vpop.f32.mrf.mxu1 }
 0x37b   :  { %v1304_v62 = vadd.f32 %v2544_v3, %v1303_v60  ;;  %v1368_v8 = vmax.f32 %v1312_v0, 0.0  ;;  %2237 = vmatpush3.bf16.msra.mxu1 %v2338_v55 }
 0x37c   :  { %v2179_v61 = vpop.f32.mrf.mxu1  ;;  %2238 = vmatprep.subr.bf16.mxu1 %v2339_v56 }
 0x37d   :  { %v1315_v63 = vadd.f32 %v2179_v61, %v2544_v3  ;;  %v1366_v6 = vmax.f32 %v1304_v62, 0.0 }
 0x37e   :  { %v1306_v1 = vpop.f32.mrf.mxu1 }
 0x37f   :  { %v1307_v2 = vadd.f32 %v2544_v3, %v1306_v1  ;;  %v1369_v4 = vmax.f32 %v1315_v63, 0.0  ;;  %2239 = vmatpush3.bf16.msra.mxu1 %v2339_v56 }
 0x380   :  { %v2182_v5 = vpop.f32.mrf.mxu1 }
 0x381   :  { %v1367_v7 = vmax.f32 %v1307_v2, 0.0  ;;  %v1383_v11 = vpack.c.bf16 %v1369_v4, %v1368_v8  ;;  %v1328_v15 = vadd.f32 %v2182_v5, %v2544_v3 }
 0x382   :  { %v1319_v9 = vpop.f32.mrf.mxu1 }
 0x383   :  { %v1382_v10 = vpack.c.bf16 %v1367_v7, %v1366_v6  ;;  %v1320_v13 = vadd.f32 %v2544_v3, %v1319_v9  ;;  %v1372_v22 = vmax.f32 %v1328_v15, 0.0 }
 0x384   :  { %v2183_v12 = vpop.f32.mrf.mxu1 }
 0x385   :  { %v1331_v14 = vadd.f32 %v2183_v12, %v2544_v3  ;;  %2208 = vmatprep.mubr.bf16.mxu0 %v1382_v10  ;;  %v1370_v20 = vmax.f32 %v1320_v13, 0.0 }
 0x386   :  { %v1322_v48 = vpop.f32.mrf.mxu1  ;;  %2209 = vmatmul.mubr.bf16.vlgmr.msra.gmra.mxu0 %v1383_v11 }
 0x387   :  { %v1323_v16 = vadd.f32 %v2544_v3, %v1322_v48  ;;  %v1373_v18 = vmax.f32 %v1331_v14, 0.0 }
 0x388   :  { %v2186_v19 = vpop.f32.mrf.mxu1 }
 0x389   :  { %v1371_v21 = vmax.f32 %v1323_v16, 0.0  ;;  %v1385_v26 = vpack.c.bf16 %v1373_v18, %v1372_v22  ;;  %v1344_v30 = vadd.f32 %v2186_v19, %v2544_v3 }
 0x38a   :  { %v1335_v23 = vpop.f32.mrf.mxu1 }
 0x38b   :  { %v1384_v24 = vpack.c.bf16 %v1371_v21, %v1370_v20  ;;  %v1336_v28 = vadd.f32 %v2544_v3, %v1335_v23  ;;  %v1376_v37 = vmax.f32 %v1344_v30, 0.0 }
 0x38c   :  { %v2187_v27 = vpop.f32.mrf.mxu1 }
 0x38d   :  { %v1347_v29 = vadd.f32 %v2187_v27, %v2544_v3  ;;  %2212 = vmatprep.mubr.bf16.mxu0 %v1384_v24  ;;  %v1374_v35 = vmax.f32 %v1336_v28, 0.0 }
 0x38e   :  { %v1338_v31 = vpop.f32.mrf.mxu1  ;;  %2213 = vmatmul.mubr.bf16.gmra.mxu0 %v1385_v26 }
 0x38f   :  { %v1339_v32 = vadd.f32 %v2544_v3, %v1338_v31  ;;  %v1377_v33 = vmax.f32 %v1347_v29, 0.0 }
 0x390   :  { %v2190_v34 = vpop.f32.mrf.mxu1 }
 0x391   :  { %v1375_v36 = vmax.f32 %v1339_v32, 0.0  ;;  %v1387_v40 = vpack.c.bf16 %v1377_v33, %v1376_v37  ;;  %v1360_v44 = vadd.f32 %v2190_v34, %v2544_v3 }
 0x392   :  { %v1351_v38 = vpop.f32.mrf.mxu1 }
 0x393   :  { %v1386_v39 = vpack.c.bf16 %v1375_v36, %v1374_v35  ;;  %v1352_v42 = vadd.f32 %v2544_v3, %v1351_v38  ;;  %v1380_v51 = vmax.f32 %v1360_v44, 0.0 }
 0x394   :  { %v2191_v41 = vpop.f32.mrf.mxu1 }
 0x395   :  { %v1363_v43 = vadd.f32 %v2191_v41, %v2544_v3  ;;  %2216 = vmatprep.mubr.bf16.mxu0 %v1386_v39  ;;  %v1378_v49 = vmax.f32 %v1352_v42, 0.0 }
 0x396   :  { %v1354_v45 = vpop.f32.mrf.mxu1  ;;  %2217 = vmatmul.mubr.bf16.gmra.mxu0 %v1387_v40 }
 0x397   :  { %v1355_v46 = vadd.f32 %v2544_v3, %v1354_v45  ;;  %v1381_v47 = vmax.f32 %v1363_v43, 0.0 }
 0x399   :  { %v1379_v50 = vmax.f32 %v1355_v46, 0.0  ;;  %v1389_v53 = vpack.c.bf16 %v1381_v47, %v1380_v51 }
 0x39b   :  { %v1388_v52 = vpack.c.bf16 %v1379_v50, %v1378_v49 }
 0x39d   :  { %2220 = vmatprep.mubr.bf16.mxu0 %v1388_v52 }
 0x39e   :  { %2221 = vmatmul.mubr.bf16.gmra.mxu0 %v1389_v53 }
 0x446   :  { %v2210_v57 = vpop.f32.mrf.mxu0 }
 0x447   :  { %v1502_v61 = vadd.f32 %v2210_v57, %v2566_v17 }
 0x448   :  { %v1493_v58 = vpop.f32.mrf.mxu0 }
 0x449   :  { %v1494_v59 = vadd.f32 %v2566_v17, %v1493_v58  ;;  %v1558_v5 = vmax.f32 %v1502_v61, 0.0 }
 0x44a   :  { %v2211_v3 = vpop.f32.mrf.mxu0 }
 0x44b   :  { %v1505_v60 = vadd.f32 %v2211_v3, %v2566_v17  ;;  %v1556_v2 = vmax.f32 %v1494_v59, 0.0 }
 0x44c   :  { %v1496_v62 = vpop.f32.mrf.mxu0 }
 0x44d   :  { %v1497_v63 = vadd.f32 %v2566_v17, %v1496_v62  ;;  %v1559_v0 = vmax.f32 %v1505_v60, 0.0 }
 0x44e   :  { %v2214_v1 = vpop.f32.mrf.mxu0 }
 0x44f   :  { %v1557_v4 = vmax.f32 %v1497_v63, 0.0  ;;  %v1573_v8 = vpack.c.bf16 %v1559_v0, %v1558_v5  ;;  %v1518_v12 = vadd.f32 %v2214_v1, %v2566_v17 }
 0x450   :  { %v1509_v6 = vpop.f32.mrf.mxu0 }
 0x451   :  { %v1572_v7 = vpack.c.bf16 %v1557_v4, %v1556_v2  ;;  %v1510_v10 = vadd.f32 %v2566_v17, %v1509_v6  ;;  %v1562_v19 = vmax.f32 %v1518_v12, 0.0 }
 0x452   :  { %v2215_v9 = vpop.f32.mrf.mxu0 }
 0x453   :  { %v1521_v11 = vadd.f32 %v2215_v9, %v2566_v17  ;;  %2240 = vmatprep.mubr.bf16.mxu1 %v1572_v7  ;;  %v1560_v16 = vmax.f32 %v1510_v10, 0.0 }
 0x454   :  { %v1512_v13 = vpop.f32.mrf.mxu0  ;;  %2241 = vmatmul.mubr.bf16.vlgmr.msra.gmra.mxu1 %v1573_v8 }
 0x455   :  { %v1513_v14 = vadd.f32 %v2566_v17, %v1512_v13  ;;  %v1563_v15 = vmax.f32 %v1521_v11, 0.0 }
 0x456   :  { %v2218_v48 = vpop.f32.mrf.mxu0 }
 0x457   :  { %v1561_v18 = vmax.f32 %v1513_v14, 0.0  ;;  %v1575_v22 = vpack.c.bf16 %v1563_v15, %v1562_v19  ;;  %v1534_v27 = vadd.f32 %v2218_v48, %v2566_v17 }
 0x458   :  { %v1525_v20 = vpop.f32.mrf.mxu0 }
 0x459   :  { %v1574_v21 = vpack.c.bf16 %v1561_v18, %v1560_v16  ;;  %v1526_v24 = vadd.f32 %v2566_v17, %v1525_v20  ;;  %v1566_v34 = vmax.f32 %v1534_v27, 0.0 }
 0x45a   :  { %v2219_v23 = vpop.f32.mrf.mxu0 }
 0x45b   :  { %v1537_v26 = vadd.f32 %v2219_v23, %v2566_v17  ;;  %2244 = vmatprep.mubr.bf16.mxu1 %v1574_v21  ;;  %v1564_v32 = vmax.f32 %v1526_v24, 0.0 }
 0x45c   :  { %v1528_v28 = vpop.f32.mrf.mxu0  ;;  %2245 = vmatmul.mubr.bf16.gmra.mxu1 %v1575_v22 }
 0x45d   :  { %v1529_v29 = vadd.f32 %v2566_v17, %v1528_v28  ;;  %v1567_v30 = vmax.f32 %v1537_v26, 0.0 }
 0x45e   :  { %v2222_v31 = vpop.f32.mrf.mxu0 }
 0x45f   :  { %v1565_v33 = vmax.f32 %v1529_v29, 0.0  ;;  %v1577_v37 = vpack.c.bf16 %v1567_v30, %v1566_v34  ;;  %v1550_v41 = vadd.f32 %v2222_v31, %v2566_v17 }
 0x460   :  { %v1541_v35 = vpop.f32.mrf.mxu0 }
 0x461   :  { %v1576_v36 = vpack.c.bf16 %v1565_v33, %v1564_v32  ;;  %v1542_v39 = vadd.f32 %v2566_v17, %v1541_v35  ;;  %v1570_v47 = vmax.f32 %v1550_v41, 0.0 }
 0x462   :  { %v2223_v38 = vpop.f32.mrf.mxu0 }
 0x463   :  { %v1553_v40 = vadd.f32 %v2223_v38, %v2566_v17  ;;  %2248 = vmatprep.mubr.bf16.mxu1 %v1576_v36  ;;  %v1568_v45 = vmax.f32 %v1542_v39, 0.0 }
 0x464   :  { %v1544_v42 = vpop.f32.mrf.mxu0  ;;  %2249 = vmatmul.mubr.bf16.gmra.mxu1 %v1577_v37 }
 0x465   :  { %v1545_v43 = vadd.f32 %v2566_v17, %v1544_v42  ;;  %v1571_v44 = vmax.f32 %v1553_v40, 0.0 }
 0x467   :  { %v1569_v46 = vmax.f32 %v1545_v43, 0.0  ;;  %v1579_v50 = vpack.c.bf16 %v1571_v44, %v1570_v47 }
 0x469   :  { %v1578_v49 = vpack.c.bf16 %v1569_v46, %v1568_v45 }
 0x46b   :  { %2252 = vmatprep.mubr.bf16.mxu1 %v1578_v49 }
 0x46c   :  { %2253 = vmatmul.mubr.bf16.gmra.mxu1 %v1579_v50 }
 0x514   :  { %v2242_v51 = vpop.f32.mrf.mxu1 }
 0x515   :  { %v1692_v52 = vadd.f32 %v2242_v51, %v2603_v25 }
 0x516   :  { %v1683_v53 = vpop.f32.mrf.mxu1 }
 0x517   :  { %1858 = vst [vmem:[%s2768_s3 + $0x90] sm:$0xff] %v1692_v52  ;;  %v1684_v54 = vadd.f32 %v2603_v25, %v1683_v53 }
 0x518   :  { %v2243_v55 = vpop.f32.mrf.mxu1 }
 0x519   :  { %1856 = vst [vmem:[%s2768_s3 + $0x80] sm:$0xff] %v1684_v54  ;;  %v1695_v17 = vadd.f32 %v2243_v55, %v2603_v25 }
 0x51a   :  { %v1686_v56 = vpop.f32.mrf.mxu1 }
 0x51b   :  { %1859 = vst [vmem:[%s2768_s3 + $0x98] sm:$0xff] %v1695_v17  ;;  %v1687_v57 = vadd.f32 %v2603_v25, %v1686_v56 }
 0x51c   :  { %v2246_v58 = vpop.f32.mrf.mxu1 }
 0x51d   :  { %1857 = vst [vmem:[%s2768_s3 + $0x88] sm:$0xff] %v1687_v57  ;;  %v1708_v3 = vadd.f32 %v2246_v58, %v2603_v25 }
 0x51e   :  { %v1699_v59 = vpop.f32.mrf.mxu1 }
 0x51f   :  { %1862 = vst [vmem:[%s2768_s3 + $0xb0] sm:$0xff] %v1708_v3  ;;  %v1700_v60 = vadd.f32 %v2603_v25, %v1699_v59 }
 0x520   :  { %v2247_v61 = vpop.f32.mrf.mxu1 }
 0x521   :  { %1860 = vst [vmem:[%s2768_s3 + $0xa0] sm:$0xff] %v1700_v60  ;;  %v1711_v62 = vadd.f32 %v2247_v61, %v2603_v25 }
 0x522   :  { %v1702_v63 = vpop.f32.mrf.mxu1 }
 0x523   :  { %1863 = vst [vmem:[%s2768_s3 + $0xb8] sm:$0xff] %v1711_v62  ;;  %v1703_v0 = vadd.f32 %v2603_v25, %v1702_v63 }
 0x524   :  { %v2250_v1 = vpop.f32.mrf.mxu1 }
 0x525   :  { %1861 = vst [vmem:[%s2768_s3 + $0xa8] sm:$0xff] %v1703_v0  ;;  %v1724_v2 = vadd.f32 %v2250_v1, %v2603_v25 }
 0x526   :  { %v1715_v4 = vpop.f32.mrf.mxu1 }
 0x527   :  { %1866 = vst [vmem:[%s2768_s3 + $0xd0] sm:$0xff] %v1724_v2  ;;  %v1716_v5 = vadd.f32 %v2603_v25, %v1715_v4 }
 0x528   :  { %v2251_v6 = vpop.f32.mrf.mxu1 }
 0x529   :  { %1864 = vst [vmem:[%s2768_s3 + $0xc0] sm:$0xff] %v1716_v5  ;;  %v1727_v7 = vadd.f32 %v2251_v6, %v2603_v25 }
 0x52a   :  { %v1718_v8 = vpop.f32.mrf.mxu1 }
 0x52b   :  { %1867 = vst [vmem:[%s2768_s3 + $0xd8] sm:$0xff] %v1727_v7  ;;  %v1719_v9 = vadd.f32 %v2603_v25, %v1718_v8 }
 0x52c   :  { %v2254_v10 = vpop.f32.mrf.mxu1 }
 0x52d   :  { %1865 = vst [vmem:[%s2768_s3 + $0xc8] sm:$0xff] %v1719_v9  ;;  %v1740_v11 = vadd.f32 %v2254_v10, %v2603_v25 }
 0x52e   :  { %v1731_v12 = vpop.f32.mrf.mxu1 }
 0x52f   :  { %1870 = vst [vmem:[%s2768_s3 + $0xf0] sm:$0xff] %v1740_v11  ;;  %v1732_v13 = vadd.f32 %v2603_v25, %v1731_v12 }
 0x530   :  { %v2255_v14 = vpop.f32.mrf.mxu1 }
 0x531   :  { %1868 = vst [vmem:[%s2768_s3 + $0xe0] sm:$0xff] %v1732_v13  ;;  %v1743_v15 = vadd.f32 %v2255_v14, %v2603_v25 }
 0x532   :  { %v1734_v48 = vpop.f32.mrf.mxu1 }
 0x533   :  { %1871 = vst [vmem:[%s2768_s3 + $0xf8] sm:$0xff] %v1743_v15  ;;  %v1735_v16 = vadd.f32 %v2603_v25, %v1734_v48 }
 0x535   :  { %1869 = vst [vmem:[%s2768_s3 + $0xe8] sm:$0xff] %v1735_v16 }
 0x536   :  { %1767 = vsyncpa [#allocation4], 1 }

</bundles_post_ra>
